<compile_context>
chip_gen: v5e
topology: v5e:2x2
jax: 0.10.0
libtpu: 0.0.40
codegen_flags: <defaults>
</compile_context>

<pallas_src>
from functools import partial

import jax
import jax.numpy as jnp
from jax.experimental import pallas as pl
from jax.experimental.pallas import tpu as pltpu

jax.config.update("jax_default_matmul_precision", "highest")

BOS_VALUE = 0.0   # value used by bos((B,1)) in the reference code
_SUBLANE = 8
_MAX_TB = 4096    # batch-tile cap: keeps double-buffered lane-padded blocks
                  # + scratch well under the 32 MiB scoped-VMEM limit set below


def _round_up(x, m=_SUBLANE):
    return -(-x // m) * m


# ----------------------------------------------------------------------------
# Single shared layout table for the packed weight slab.
# Every segment is padded to an 8-row multiple; the slab is 128 lanes wide
# (or round_up(max dim, 128) if a dim ever exceeds 128).
# ----------------------------------------------------------------------------
def _segments(F, L, H):
    return (
        ("we1_fp", F, H), ("we1_ipd", L, H), ("be1", 1, H), ("whh", H, H),
        ("bh", 1, H), ("wih", 1, H), ("wd1", L, H), ("bd1", 1, H),
        ("who_t", 1, H),
        ("we2", H, L), ("be2", 1, L), ("we2_cum", H, L), ("be2_cum", 1, L),
        ("bo_row", 1, L),
        ("wd2", H, F), ("bd2", 1, F),
    )


def _slab_layout(F, L, H):
    segs = _segments(F, L, H)
    width = _round_up(max(c for _, _, c in segs), 128)
    layout, off = {}, 0
    for name, rows, cols in segs:
        layout[name] = (off, rows, cols)
        off += _round_up(rows)
    return layout, off, width


def _choose_batch_tile(B):
    """Batch tile: whole batch when small, >=2 tiles for big B (v7x), <= _MAX_TB."""
    n_tiles = max(1, -(-B // _MAX_TB))
    if n_tiles == 1 and B >= 1024:
        n_tiles = 2              # give both v7x TensorCores work
    return _round_up(-(-B // n_tiles))


# ----------------------------------------------------------------------------
# Fused Pallas kernel: encoder MLP + folded cumsum + recurrent approximator +
# decoder MLP.  Weights come in one resident 128-lane slab.
# ----------------------------------------------------------------------------
def _make_kernel(F, L, H):
    layout, _, _ = _slab_layout(F, L, H)

    def kernel(fp_ref, ipd_ref, w_ref, out_ref, noisy_sc):
        f32 = jnp.float32

        def seg(name):
            off, rows, cols = layout[name]
            return w_ref[off:off + rows, :cols]

        fp = fp_ref[...]                    # (TB, F)
        ipd = ipd_ref[...]                  # (TB, L)
        TB = ipd.shape[0]

        we1_fp, we1_ipd, be1 = seg("we1_fp"), seg("we1_ipd"), seg("be1")
        whh, bh, wih, who_t = seg("whh"), seg("bh"), seg("wih"), seg("who_t")
        wd1, bd1 = seg("wd1"), seg("bd1")
        we2, be2 = seg("we2"), seg("be2")
        we2_cum, be2_cum, bo_row = seg("we2_cum"), seg("be2_cum"), seg("bo_row")
        wd2, bd2 = seg("wd2"), seg("bd2")

        # ---- Encoder MLP (split matmul == cat(fp, ipd) @ we1, no concat) ----
        h1 = (jnp.dot(fp, we1_fp, preferred_element_type=f32)
              + jnp.dot(ipd, we1_ipd, preferred_element_type=f32)
              + be1)
        h1 = jnp.maximum(h1, 0.0)
        delays = jnp.dot(h1, we2, preferred_element_type=f32) + be2
        out_ref[:, 0:L] = delays                                   # (TB, L)

        # ---- cumsum(delays, dim=1) folded into packed weights ---------------
        # delays @ triu(1) == h1 @ (we2 @ triu(1)) + cumsum(be2): no iota /
        # compare / (TB,L)@(L,L) matmul, and independent of the delays result.
        cum_delays = jnp.dot(h1, we2_cum, preferred_element_type=f32) + be2_cum

        # ---- Recurrent approximator.translate()[:, :L] -----------------------
        # h_t = tanh(x_t W_ih + h_{t-1} W_hh + b_h);  y_t = h_t W_ho + b_o
        # inputs = [bos, ipd[:, :L-1]].  Only h@whh is on the serial critical
        # path; the input projection is a VPU outer product and the output
        # projection is an off-path reduce into a scratch column.
        # f32 matmuls kept for exactness; L is small & static -> full unroll.
        # (use lax.fori_loop(..., unroll=4..8) if L ever becomes large)
        h = jnp.broadcast_to(jnp.tanh(BOS_VALUE * wih + bh), (TB, H))
        noisy_sc[:, 0:1] = jnp.sum(h * who_t, axis=1, keepdims=True)
        for t in range(1, L):
            xproj = ipd[:, t - 1:t] * wih          # (TB,1)*(1,H) outer product
            h = jnp.tanh(xproj
                         + jnp.dot(h, whh, preferred_element_type=f32)
                         + bh)
            noisy_sc[:, t:t + 1] = jnp.sum(h * who_t, axis=1, keepdims=True)
        noisy = noisy_sc[...] + bo_row                             # (TB, L)

        # ---- marked ipd + decoder MLP ---------------------------------------
        marked = noisy + cum_delays                                # (TB, L)
        hd = jnp.maximum(
            jnp.dot(marked, wd1, preferred_element_type=f32) + bd1, 0.0)
        out_ref[:, L:L + F] = (
            jnp.dot(hd, wd2, preferred_element_type=f32) + bd2)    # (TB, F)

    return kernel


# ----------------------------------------------------------------------------
# Wrapper: batch grid ("parallel" -> shards across v7x TCs), weights resident.
# ----------------------------------------------------------------------------
@partial(jax.jit, static_argnames=("H",))
def finn_ssi_forward(fingerprint, ipd, w_slab, *, H):
    B, F = fingerprint.shape
    _, L = ipd.shape

    TB = _choose_batch_tile(B)
    B_pad = _round_up(B, TB)
    if B_pad != B:
        fingerprint = jnp.pad(fingerprint, ((0, B_pad - B), (0, 0)))
        ipd = jnp.pad(ipd, ((0, B_pad - B), (0, 0)))
    grid = (B_pad // TB,)

    out = pl.pallas_call(
        _make_kernel(F, L, H),
        out_shape=jax.ShapeDtypeStruct((B_pad, L + F), jnp.float32),
        grid_spec=pltpu.PrefetchScalarGridSpec(
            num_scalar_prefetch=0,
            grid=grid,
            in_specs=[
                pl.BlockSpec((TB, F), lambda i: (i, 0)),
                pl.BlockSpec((TB, L), lambda i: (i, 0)),
                pl.BlockSpec(w_slab.shape, lambda i: (0, 0)),  # weights resident
            ],
            out_specs=pl.BlockSpec((TB, L + F), lambda i: (i, 0)),
            scratch_shapes=[pltpu.VMEM((TB, L), jnp.float32)],
        ),
        compiler_params=pltpu.CompilerParams(
            dimension_semantics=("parallel",),
            vmem_limit_bytes=32 * 1024 * 1024),
    )(fingerprint, ipd, w_slab)

    return out[:B, 0:L], out[:B, L:L + F]


# ----------------------------------------------------------------------------
# Parameter init (raw tensors, shapes implied by the module's forward) and
# one-time packing into the single slab consumed by the kernel.
# ----------------------------------------------------------------------------
def init_params(key, F, L, H):
    ks = jax.random.split(key, 7)

    def lin(k, fan_in, shape):
        return jax.random.normal(k, shape, jnp.float32) / jnp.sqrt(fan_in)

    we1 = lin(ks[0], F + L, (F + L, H))
    be1 = jnp.zeros((1, H), jnp.float32)
    we2 = lin(ks[1], H, (H, L))
    be2 = jnp.zeros((1, L), jnp.float32)

    wih = lin(ks[2], 1, (1, H))
    whh = lin(ks[3], H, (H, H))
    bh = jnp.zeros((1, H), jnp.float32)
    who = lin(ks[4], H, (H, 1))
    bo = jnp.zeros((1, 1), jnp.float32)

    wd1 = lin(ks[5], L, (L, H))
    bd1 = jnp.zeros((1, H), jnp.float32)
    wd2 = lin(ks[6], H, (H, F))
    bd2 = jnp.zeros((1, F), jnp.float32)

    return (we1, be1, we2, be2, wih, whh, bh, who, bo, wd1, bd1, wd2, bd2)


def pack_params(params, F, L, H):
    """Pack the 13 tiny tensors into ONE 128-lane slab (done once, not per call)."""
    (we1, be1, we2, be2, wih, whh, bh, who, bo, wd1, bd1, wd2, bd2) = params
    layout, total_rows, width = _slab_layout(F, L, H)

    # Fold the cumsum triangle into the encoder's second layer.
    tri = jnp.triu(jnp.ones((L, L), jnp.float32))         # tri[r,c] = (r <= c)
    tensors = {
        "we1_fp": we1[:F], "we1_ipd": we1[F:], "be1": be1, "whh": whh,
        "bh": bh, "wih": wih, "wd1": wd1, "bd1": bd1, "who_t": who.T,
        "we2": we2, "be2": be2,
        "we2_cum": we2 @ tri, "be2_cum": jnp.cumsum(be2, axis=1),
        "bo_row": jnp.broadcast_to(bo, (1, L)),
        "wd2": wd2, "bd2": bd2,
    }
    slab = jnp.zeros((total_rows, width), jnp.float32)
    for name, (off, rows, cols) in layout.items():
        t = tensors[name]
        assert t.shape == (rows, cols), (name, t.shape, (rows, cols))
        slab = slab.at[off:off + rows, :cols].set(t.astype(jnp.float32))
    return slab


# ----------------------------------------------------------------------------
# Pure-JAX reference (same math, raw params) to sanity-check the kernel.
# ----------------------------------------------------------------------------
def reference_forward(fingerprint, ipd, params):
    (we1, be1, we2, be2, wih, whh, bh, who, bo, wd1, bd1, wd2, bd2) = params
    B, F = fingerprint.shape
    _, L = ipd.shape
    enc_in = jnp.concatenate([fingerprint, ipd], axis=1)
    delays = jnp.maximum(enc_in @ we1 + be1, 0.0) @ we2 + be2

    bos = jnp.full((B, 1), BOS_VALUE, dtype=ipd.dtype)
    inp = jnp.concatenate([bos, ipd], axis=1)
    h = jnp.zeros((B, wih.shape[1]), jnp.float32)
    outs = []
    for t in range(L):
        x_t = inp[:, t:t + 1]
        h = jnp.tanh(x_t @ wih + h @ whh + bh)
        outs.append(h @ who + bo)
    noisy = jnp.concatenate(outs, axis=1)

    marked = noisy + jnp.cumsum(delays, axis=1)
    fp_out = jnp.maximum(marked @ wd1 + bd1, 0.0) @ wd2 + bd2
    return delays, fp_out


if __name__ == "__main__":
    B, F, L, H = 2, 4, 8, 32   # batch, fingerprint len, ipd seq len, hidden

    key = jax.random.PRNGKey(0)
    k_fp, k_ipd, k_params = jax.random.split(key, 3)
    fingerprint = jax.random.bernoulli(k_fp, 0.5, (B, F)).astype(jnp.float32)
    ipd = jax.random.uniform(k_ipd, (B, L), jnp.float32, 0.0, 1.0)

    raw_params = init_params(k_params, F, L, H)
    w_slab = pack_params(raw_params, F, L, H)

    delays, fp_out = finn_ssi_forward(fingerprint, ipd, w_slab, H=H)
    jax.block_until_ready((delays, fp_out))

    d_ref, f_ref = reference_forward(fingerprint, ipd, raw_params)
    assert delays.shape == (B, L) and fp_out.shape == (B, F)
    # All-f32 path (reference at matmul precision "highest"): tight tolerance
    # so any future bf16 change must be an explicit decision.
    assert jnp.allclose(delays, d_ref, rtol=1e-4, atol=1e-4)
    assert jnp.allclose(fp_out, f_ref, rtol=1e-4, atol=1e-4)

    print("KERNEL_OK")
</pallas_src>

<mosaic_0001>
module attributes {stable_mosaic.version = 11 : i64} {
  func.func @kernel(%arg0: i32, %arg1: memref<8x4xf32, #tpu.memory_space<vmem>>, %arg2: memref<8x8xf32, #tpu.memory_space<vmem>>, %arg3: memref<224x128xf32, #tpu.memory_space<vmem>>, %arg4: memref<8x12xf32, #tpu.memory_space<vmem>>, %arg5: memref<8x8xf32, #tpu.memory_space<vmem>>) attributes {dimension_semantics = [#tpu.dimension_semantics<parallel>], iteration_bounds = array<i64: 1>, scalar_prefetch = 0 : i64, scratch_operands = 1 : i64, tpu.core_type = #tpu.core_type<tc>, window_params = [{transform_indices = @transform_0, window_bounds = array<i64: 8, 4>}, {transform_indices = @transform_1, window_bounds = array<i64: 8, 8>}, {pipeline_mode = #tpu.pipeline_mode<synchronous>, transform_indices = @transform_2, window_bounds = array<i64: 224, 128>}, {transform_indices = @transform_3, window_bounds = array<i64: 8, 12>}]} {
    %c0 = arith.constant 0 : index
    %c0_0 = arith.constant 0 : index
    %0 = vector.load %arg1[%c0, %c0_0] : memref<8x4xf32, #tpu.memory_space<vmem>>, vector<8x4xf32>
    %c0_1 = arith.constant 0 : index
    %c0_2 = arith.constant 0 : index
    %1 = vector.load %arg2[%c0_1, %c0_2] : memref<8x8xf32, #tpu.memory_space<vmem>>, vector<8x8xf32>
    %c0_3 = arith.constant 0 : index
    %c0_4 = arith.constant 0 : index
    %2 = vector.load %arg3[%c0_3, %c0_4] : memref<224x128xf32, #tpu.memory_space<vmem>>, vector<4x32xf32>
    %c8 = arith.constant 8 : index
    %c0_5 = arith.constant 0 : index
    %3 = vector.load %arg3[%c8, %c0_5] : memref<224x128xf32, #tpu.memory_space<vmem>>, vector<8x32xf32>
    %c16 = arith.constant 16 : index
    %c0_6 = arith.constant 0 : index
    %4 = vector.load %arg3[%c16, %c0_6] : memref<224x128xf32, #tpu.memory_space<vmem>>, vector<1x32xf32>
    %c24 = arith.constant 24 : index
    %c0_7 = arith.constant 0 : index
    %5 = vector.load %arg3[%c24, %c0_7] : memref<224x128xf32, #tpu.memory_space<vmem>>, vector<32x32xf32>
    %c56 = arith.constant 56 : index
    %c0_8 = arith.constant 0 : index
    %6 = vector.load %arg3[%c56, %c0_8] : memref<224x128xf32, #tpu.memory_space<vmem>>, vector<1x32xf32>
    %c64 = arith.constant 64 : index
    %c0_9 = arith.constant 0 : index
    %7 = vector.load %arg3[%c64, %c0_9] : memref<224x128xf32, #tpu.memory_space<vmem>>, vector<1x32xf32>
    %c88 = arith.constant 88 : index
    %c0_10 = arith.constant 0 : index
    %8 = vector.load %arg3[%c88, %c0_10] : memref<224x128xf32, #tpu.memory_space<vmem>>, vector<1x32xf32>
    %c72 = arith.constant 72 : index
    %c0_11 = arith.constant 0 : index
    %9 = vector.load %arg3[%c72, %c0_11] : memref<224x128xf32, #tpu.memory_space<vmem>>, vector<8x32xf32>
    %c80 = arith.constant 80 : index
    %c0_12 = arith.constant 0 : index
    %10 = vector.load %arg3[%c80, %c0_12] : memref<224x128xf32, #tpu.memory_space<vmem>>, vector<1x32xf32>
    %c96 = arith.constant 96 : index
    %c0_13 = arith.constant 0 : index
    %11 = vector.load %arg3[%c96, %c0_13] : memref<224x128xf32, #tpu.memory_space<vmem>>, vector<32x8xf32>
    %c128 = arith.constant 128 : index
    %c0_14 = arith.constant 0 : index
    %12 = vector.load %arg3[%c128, %c0_14] : memref<224x128xf32, #tpu.memory_space<vmem>>, vector<1x8xf32>
    %c136 = arith.constant 136 : index
    %c0_15 = arith.constant 0 : index
    %13 = vector.load %arg3[%c136, %c0_15] : memref<224x128xf32, #tpu.memory_space<vmem>>, vector<32x8xf32>
    %c168 = arith.constant 168 : index
    %c0_16 = arith.constant 0 : index
    %14 = vector.load %arg3[%c168, %c0_16] : memref<224x128xf32, #tpu.memory_space<vmem>>, vector<1x8xf32>
    %c176 = arith.constant 176 : index
    %c0_17 = arith.constant 0 : index
    %15 = vector.load %arg3[%c176, %c0_17] : memref<224x128xf32, #tpu.memory_space<vmem>>, vector<1x8xf32>
    %c184 = arith.constant 184 : index
    %c0_18 = arith.constant 0 : index
    %16 = vector.load %arg3[%c184, %c0_18] : memref<224x128xf32, #tpu.memory_space<vmem>>, vector<32x4xf32>
    %c216 = arith.constant 216 : index
    %c0_19 = arith.constant 0 : index
    %17 = vector.load %arg3[%c216, %c0_19] : memref<224x128xf32, #tpu.memory_space<vmem>>, vector<1x4xf32>
    %cst = arith.constant dense<0.000000e+00> : vector<8x32xf32>
    %18 = tpu.matmul %0, %2, %cst {dimension_numbers = #tpu.dot_dimension_numbers<[1], [0], [0], [1], [0, 0, 1, 1], [], []>, precision = #tpu.contract_precision<fp32>} : vector<8x4xf32>, vector<4x32xf32>, vector<8x32xf32> -> vector<8x32xf32>
    %cst_20 = arith.constant dense<0.000000e+00> : vector<8x32xf32>
    %19 = tpu.matmul %1, %3, %cst_20 {dimension_numbers = #tpu.dot_dimension_numbers<[1], [0], [0], [1], [0, 0, 1, 1], [], []>, precision = #tpu.contract_precision<fp32>} : vector<8x8xf32>, vector<8x32xf32>, vector<8x32xf32> -> vector<8x32xf32>
    %20 = arith.addf %18, %19 : vector<8x32xf32>
    %21 = vector.broadcast %4 : vector<1x32xf32> to vector<8x32xf32>
    %22 = arith.addf %20, %21 : vector<8x32xf32>
    %cst_21 = arith.constant 0.000000e+00 : f32
    %23 = vector.broadcast %cst_21 : f32 to vector<8x32xf32>
    %24 = arith.maximumf %22, %23 : vector<8x32xf32>
    %cst_22 = arith.constant dense<0.000000e+00> : vector<8x8xf32>
    %25 = tpu.matmul %24, %11, %cst_22 {dimension_numbers = #tpu.dot_dimension_numbers<[1], [0], [0], [1], [0, 0, 1, 1], [], []>, precision = #tpu.contract_precision<fp32>} : vector<8x32xf32>, vector<32x8xf32>, vector<8x8xf32> -> vector<8x8xf32>
    %26 = vector.broadcast %12 : vector<1x8xf32> to vector<8x8xf32>
    %27 = arith.addf %25, %26 : vector<8x8xf32>
    %c0_23 = arith.constant 0 : index
    %c0_24 = arith.constant 0 : index
    %28 = vector.load %arg4[%c0_23, %c0_24] : memref<8x12xf32, #tpu.memory_space<vmem>>, vector<8x8xf32>
    tpu.vector_store %arg4[%c0_23, %c0_24], %27 {strides = array<i32>} : memref<8x12xf32, #tpu.memory_space<vmem>>, vector<8x8xf32>,
    %cst_25 = arith.constant dense<0.000000e+00> : vector<8x8xf32>
    %29 = tpu.matmul %24, %13, %cst_25 {dimension_numbers = #tpu.dot_dimension_numbers<[1], [0], [0], [1], [0, 0, 1, 1], [], []>, precision = #tpu.contract_precision<fp32>} : vector<8x32xf32>, vector<32x8xf32>, vector<8x8xf32> -> vector<8x8xf32>
    %30 = vector.broadcast %14 : vector<1x8xf32> to vector<8x8xf32>
    %31 = arith.addf %29, %30 : vector<8x8xf32>
    %cst_26 = arith.constant 0.000000e+00 : f32
    %32 = vector.broadcast %cst_26 : f32 to vector<1x32xf32>
    %33 = arith.mulf %32, %7 : vector<1x32xf32>
    %34 = arith.addf %33, %6 : vector<1x32xf32>
    %35 = math.tanh %34 : vector<1x32xf32>
    %36 = vector.shape_cast %35 : vector<1x32xf32> to vector<1x32xf32>
    %37 = vector.broadcast %36 : vector<1x32xf32> to vector<8x32xf32>
    %38 = vector.broadcast %8 : vector<1x32xf32> to vector<8x32xf32>
    %39 = arith.mulf %37, %38 : vector<8x32xf32>
    %cst_27 = arith.constant dense<0.000000e+00> : vector<8xf32>
    %40 = vector.multi_reduction <add>, %39, %cst_27 [1] : vector<8x32xf32> to vector<8xf32>
    %41 = vector.shape_cast %40 : vector<8xf32> to vector<8x1xf32>
    %c0_28 = arith.constant 0 : index
    %c0_29 = arith.constant 0 : index
    %42 = vector.load %arg5[%c0_28, %c0_29] : memref<8x8xf32, #tpu.memory_space<vmem>>, vector<8x1xf32>
    tpu.vector_store %arg5[%c0_28, %c0_29], %41 {strides = array<i32>} : memref<8x8xf32, #tpu.memory_space<vmem>>, vector<8x1xf32>,
    %43 = vector.extract_strided_slice %1 {offsets = [0, 0], sizes = [8, 1], strides = [1, 1]} : vector<8x8xf32> to vector<8x1xf32>
    %44 = vector.broadcast %43 : vector<8x1xf32> to vector<8x32xf32>
    %45 = vector.broadcast %7 : vector<1x32xf32> to vector<8x32xf32>
    %46 = arith.mulf %44, %45 : vector<8x32xf32>
    %cst_30 = arith.constant dense<0.000000e+00> : vector<8x32xf32>
    %47 = tpu.matmul %37, %5, %cst_30 {dimension_numbers = #tpu.dot_dimension_numbers<[1], [0], [0], [1], [0, 0, 1, 1], [], []>, precision = #tpu.contract_precision<fp32>} : vector<8x32xf32>, vector<32x32xf32>, vector<8x32xf32> -> vector<8x32xf32>
    %48 = arith.addf %46, %47 : vector<8x32xf32>
    %49 = vector.broadcast %6 : vector<1x32xf32> to vector<8x32xf32>
    %50 = arith.addf %48, %49 : vector<8x32xf32>
    %51 = math.tanh %50 : vector<8x32xf32>
    %52 = vector.broadcast %8 : vector<1x32xf32> to vector<8x32xf32>
    %53 = arith.mulf %51, %52 : vector<8x32xf32>
    %cst_31 = arith.constant dense<0.000000e+00> : vector<8xf32>
    %54 = vector.multi_reduction <add>, %53, %cst_31 [1] : vector<8x32xf32> to vector<8xf32>
    %55 = vector.shape_cast %54 : vector<8xf32> to vector<8x1xf32>
    %c0_32 = arith.constant 0 : index
    %c1 = arith.constant 1 : index
    %56 = vector.load %arg5[%c0_32, %c1] : memref<8x8xf32, #tpu.memory_space<vmem>>, vector<8x1xf32>
    tpu.vector_store %arg5[%c0_32, %c1], %55 {strides = array<i32>} : memref<8x8xf32, #tpu.memory_space<vmem>>, vector<8x1xf32>,
    %57 = vector.extract_strided_slice %1 {offsets = [0, 1], sizes = [8, 1], strides = [1, 1]} : vector<8x8xf32> to vector<8x1xf32>
    %58 = vector.broadcast %57 : vector<8x1xf32> to vector<8x32xf32>
    %59 = vector.broadcast %7 : vector<1x32xf32> to vector<8x32xf32>
    %60 = arith.mulf %58, %59 : vector<8x32xf32>
    %cst_33 = arith.constant dense<0.000000e+00> : vector<8x32xf32>
    %61 = tpu.matmul %51, %5, %cst_33 {dimension_numbers = #tpu.dot_dimension_numbers<[1], [0], [0], [1], [0, 0, 1, 1], [], []>, precision = #tpu.contract_precision<fp32>} : vector<8x32xf32>, vector<32x32xf32>, vector<8x32xf32> -> vector<8x32xf32>
    %62 = arith.addf %60, %61 : vector<8x32xf32>
    %63 = vector.broadcast %6 : vector<1x32xf32> to vector<8x32xf32>
    %64 = arith.addf %62, %63 : vector<8x32xf32>
    %65 = math.tanh %64 : vector<8x32xf32>
    %66 = vector.broadcast %8 : vector<1x32xf32> to vector<8x32xf32>
    %67 = arith.mulf %65, %66 : vector<8x32xf32>
    %cst_34 = arith.constant dense<0.000000e+00> : vector<8xf32>
    %68 = vector.multi_reduction <add>, %67, %cst_34 [1] : vector<8x32xf32> to vector<8xf32>
    %69 = vector.shape_cast %68 : vector<8xf32> to vector<8x1xf32>
    %c0_35 = arith.constant 0 : index
    %c2 = arith.constant 2 : index
    %70 = vector.load %arg5[%c0_35, %c2] : memref<8x8xf32, #tpu.memory_space<vmem>>, vector<8x1xf32>
    tpu.vector_store %arg5[%c0_35, %c2], %69 {strides = array<i32>} : memref<8x8xf32, #tpu.memory_space<vmem>>, vector<8x1xf32>,
    %71 = vector.extract_strided_slice %1 {offsets = [0, 2], sizes = [8, 1], strides = [1, 1]} : vector<8x8xf32> to vector<8x1xf32>
    %72 = vector.broadcast %71 : vector<8x1xf32> to vector<8x32xf32>
    %73 = vector.broadcast %7 : vector<1x32xf32> to vector<8x32xf32>
    %74 = arith.mulf %72, %73 : vector<8x32xf32>
    %cst_36 = arith.constant dense<0.000000e+00> : vector<8x32xf32>
    %75 = tpu.matmul %65, %5, %cst_36 {dimension_numbers = #tpu.dot_dimension_numbers<[1], [0], [0], [1], [0, 0, 1, 1], [], []>, precision = #tpu.contract_precision<fp32>} : vector<8x32xf32>, vector<32x32xf32>, vector<8x32xf32> -> vector<8x32xf32>
    %76 = arith.addf %74, %75 : vector<8x32xf32>
    %77 = vector.broadcast %6 : vector<1x32xf32> to vector<8x32xf32>
    %78 = arith.addf %76, %77 : vector<8x32xf32>
    %79 = math.tanh %78 : vector<8x32xf32>
    %80 = vector.broadcast %8 : vector<1x32xf32> to vector<8x32xf32>
    %81 = arith.mulf %79, %80 : vector<8x32xf32>
    %cst_37 = arith.constant dense<0.000000e+00> : vector<8xf32>
    %82 = vector.multi_reduction <add>, %81, %cst_37 [1] : vector<8x32xf32> to vector<8xf32>
    %83 = vector.shape_cast %82 : vector<8xf32> to vector<8x1xf32>
    %c0_38 = arith.constant 0 : index
    %c3 = arith.constant 3 : index
    %84 = vector.load %arg5[%c0_38, %c3] : memref<8x8xf32, #tpu.memory_space<vmem>>, vector<8x1xf32>
    tpu.vector_store %arg5[%c0_38, %c3], %83 {strides = array<i32>} : memref<8x8xf32, #tpu.memory_space<vmem>>, vector<8x1xf32>,
    %85 = vector.extract_strided_slice %1 {offsets = [0, 3], sizes = [8, 1], strides = [1, 1]} : vector<8x8xf32> to vector<8x1xf32>
    %86 = vector.broadcast %85 : vector<8x1xf32> to vector<8x32xf32>
    %87 = vector.broadcast %7 : vector<1x32xf32> to vector<8x32xf32>
    %88 = arith.mulf %86, %87 : vector<8x32xf32>
    %cst_39 = arith.constant dense<0.000000e+00> : vector<8x32xf32>
    %89 = tpu.matmul %79, %5, %cst_39 {dimension_numbers = #tpu.dot_dimension_numbers<[1], [0], [0], [1], [0, 0, 1, 1], [], []>, precision = #tpu.contract_precision<fp32>} : vector<8x32xf32>, vector<32x32xf32>, vector<8x32xf32> -> vector<8x32xf32>
    %90 = arith.addf %88, %89 : vector<8x32xf32>
    %91 = vector.broadcast %6 : vector<1x32xf32> to vector<8x32xf32>
    %92 = arith.addf %90, %91 : vector<8x32xf32>
    %93 = math.tanh %92 : vector<8x32xf32>
    %94 = vector.broadcast %8 : vector<1x32xf32> to vector<8x32xf32>
    %95 = arith.mulf %93, %94 : vector<8x32xf32>
    %cst_40 = arith.constant dense<0.000000e+00> : vector<8xf32>
    %96 = vector.multi_reduction <add>, %95, %cst_40 [1] : vector<8x32xf32> to vector<8xf32>
    %97 = vector.shape_cast %96 : vector<8xf32> to vector<8x1xf32>
    %c0_41 = arith.constant 0 : index
    %c4 = arith.constant 4 : index
    %98 = vector.load %arg5[%c0_41, %c4] : memref<8x8xf32, #tpu.memory_space<vmem>>, vector<8x1xf32>
    tpu.vector_store %arg5[%c0_41, %c4], %97 {strides = array<i32>} : memref<8x8xf32, #tpu.memory_space<vmem>>, vector<8x1xf32>,
    %99 = vector.extract_strided_slice %1 {offsets = [0, 4], sizes = [8, 1], strides = [1, 1]} : vector<8x8xf32> to vector<8x1xf32>
    %100 = vector.broadcast %99 : vector<8x1xf32> to vector<8x32xf32>
    %101 = vector.broadcast %7 : vector<1x32xf32> to vector<8x32xf32>
    %102 = arith.mulf %100, %101 : vector<8x32xf32>
    %cst_42 = arith.constant dense<0.000000e+00> : vector<8x32xf32>
    %103 = tpu.matmul %93, %5, %cst_42 {dimension_numbers = #tpu.dot_dimension_numbers<[1], [0], [0], [1], [0, 0, 1, 1], [], []>, precision = #tpu.contract_precision<fp32>} : vector<8x32xf32>, vector<32x32xf32>, vector<8x32xf32> -> vector<8x32xf32>
    %104 = arith.addf %102, %103 : vector<8x32xf32>
    %105 = vector.broadcast %6 : vector<1x32xf32> to vector<8x32xf32>
    %106 = arith.addf %104, %105 : vector<8x32xf32>
    %107 = math.tanh %106 : vector<8x32xf32>
    %108 = vector.broadcast %8 : vector<1x32xf32> to vector<8x32xf32>
    %109 = arith.mulf %107, %108 : vector<8x32xf32>
    %cst_43 = arith.constant dense<0.000000e+00> : vector<8xf32>
    %110 = vector.multi_reduction <add>, %109, %cst_43 [1] : vector<8x32xf32> to vector<8xf32>
    %111 = vector.shape_cast %110 : vector<8xf32> to vector<8x1xf32>
    %c0_44 = arith.constant 0 : index
    %c5 = arith.constant 5 : index
    %112 = vector.load %arg5[%c0_44, %c5] : memref<8x8xf32, #tpu.memory_space<vmem>>, vector<8x1xf32>
    tpu.vector_store %arg5[%c0_44, %c5], %111 {strides = array<i32>} : memref<8x8xf32, #tpu.memory_space<vmem>>, vector<8x1xf32>,
    %113 = vector.extract_strided_slice %1 {offsets = [0, 5], sizes = [8, 1], strides = [1, 1]} : vector<8x8xf32> to vector<8x1xf32>
    %114 = vector.broadcast %113 : vector<8x1xf32> to vector<8x32xf32>
    %115 = vector.broadcast %7 : vector<1x32xf32> to vector<8x32xf32>
    %116 = arith.mulf %114, %115 : vector<8x32xf32>
    %cst_45 = arith.constant dense<0.000000e+00> : vector<8x32xf32>
    %117 = tpu.matmul %107, %5, %cst_45 {dimension_numbers = #tpu.dot_dimension_numbers<[1], [0], [0], [1], [0, 0, 1, 1], [], []>, precision = #tpu.contract_precision<fp32>} : vector<8x32xf32>, vector<32x32xf32>, vector<8x32xf32> -> vector<8x32xf32>
    %118 = arith.addf %116, %117 : vector<8x32xf32>
    %119 = vector.broadcast %6 : vector<1x32xf32> to vector<8x32xf32>
    %120 = arith.addf %118, %119 : vector<8x32xf32>
    %121 = math.tanh %120 : vector<8x32xf32>
    %122 = vector.broadcast %8 : vector<1x32xf32> to vector<8x32xf32>
    %123 = arith.mulf %121, %122 : vector<8x32xf32>
    %cst_46 = arith.constant dense<0.000000e+00> : vector<8xf32>
    %124 = vector.multi_reduction <add>, %123, %cst_46 [1] : vector<8x32xf32> to vector<8xf32>
    %125 = vector.shape_cast %124 : vector<8xf32> to vector<8x1xf32>
    %c0_47 = arith.constant 0 : index
    %c6 = arith.constant 6 : index
    %126 = vector.load %arg5[%c0_47, %c6] : memref<8x8xf32, #tpu.memory_space<vmem>>, vector<8x1xf32>
    tpu.vector_store %arg5[%c0_47, %c6], %125 {strides = array<i32>} : memref<8x8xf32, #tpu.memory_space<vmem>>, vector<8x1xf32>,
    %127 = vector.extract_strided_slice %1 {offsets = [0, 6], sizes = [8, 1], strides = [1, 1]} : vector<8x8xf32> to vector<8x1xf32>
    %128 = vector.broadcast %127 : vector<8x1xf32> to vector<8x32xf32>
    %129 = vector.broadcast %7 : vector<1x32xf32> to vector<8x32xf32>
    %130 = arith.mulf %128, %129 : vector<8x32xf32>
    %cst_48 = arith.constant dense<0.000000e+00> : vector<8x32xf32>
    %131 = tpu.matmul %121, %5, %cst_48 {dimension_numbers = #tpu.dot_dimension_numbers<[1], [0], [0], [1], [0, 0, 1, 1], [], []>, precision = #tpu.contract_precision<fp32>} : vector<8x32xf32>, vector<32x32xf32>, vector<8x32xf32> -> vector<8x32xf32>
    %132 = arith.addf %130, %131 : vector<8x32xf32>
    %133 = vector.broadcast %6 : vector<1x32xf32> to vector<8x32xf32>
    %134 = arith.addf %132, %133 : vector<8x32xf32>
    %135 = math.tanh %134 : vector<8x32xf32>
    %136 = vector.broadcast %8 : vector<1x32xf32> to vector<8x32xf32>
    %137 = arith.mulf %135, %136 : vector<8x32xf32>
    %cst_49 = arith.constant dense<0.000000e+00> : vector<8xf32>
    %138 = vector.multi_reduction <add>, %137, %cst_49 [1] : vector<8x32xf32> to vector<8xf32>
    %139 = vector.shape_cast %138 : vector<8xf32> to vector<8x1xf32>
    %c0_50 = arith.constant 0 : index
    %c7 = arith.constant 7 : index
    %140 = vector.load %arg5[%c0_50, %c7] : memref<8x8xf32, #tpu.memory_space<vmem>>, vector<8x1xf32>
    tpu.vector_store %arg5[%c0_50, %c7], %139 {strides = array<i32>} : memref<8x8xf32, #tpu.memory_space<vmem>>, vector<8x1xf32>,
    %c0_51 = arith.constant 0 : index
    %c0_52 = arith.constant 0 : index
    %141 = vector.load %arg5[%c0_51, %c0_52] : memref<8x8xf32, #tpu.memory_space<vmem>>, vector<8x8xf32>
    %142 = vector.broadcast %15 : vector<1x8xf32> to vector<8x8xf32>
    %143 = arith.addf %141, %142 : vector<8x8xf32>
    %144 = arith.addf %143, %31 : vector<8x8xf32>
    %cst_53 = arith.constant dense<0.000000e+00> : vector<8x32xf32>
    %145 = tpu.matmul %144, %9, %cst_53 {dimension_numbers = #tpu.dot_dimension_numbers<[1], [0], [0], [1], [0, 0, 1, 1], [], []>, precision = #tpu.contract_precision<fp32>} : vector<8x8xf32>, vector<8x32xf32>, vector<8x32xf32> -> vector<8x32xf32>
    %146 = vector.broadcast %10 : vector<1x32xf32> to vector<8x32xf32>
    %147 = arith.addf %145, %146 : vector<8x32xf32>
    %cst_54 = arith.constant 0.000000e+00 : f32
    %148 = vector.broadcast %cst_54 : f32 to vector<8x32xf32>
    %149 = arith.maximumf %147, %148 : vector<8x32xf32>
    %cst_55 = arith.constant dense<0.000000e+00> : vector<8x4xf32>
    %150 = tpu.matmul %149, %16, %cst_55 {dimension_numbers = #tpu.dot_dimension_numbers<[1], [0], [0], [1], [0, 0, 1, 1], [], []>, precision = #tpu.contract_precision<fp32>} : vector<8x32xf32>, vector<32x4xf32>, vector<8x4xf32> -> vector<8x4xf32>
    %151 = vector.broadcast %17 : vector<1x4xf32> to vector<8x4xf32>
    %152 = arith.addf %150, %151 : vector<8x4xf32>
    %c0_56 = arith.constant 0 : index
    %c8_57 = arith.constant 8 : index
    %153 = vector.load %arg4[%c0_56, %c8_57] : memref<8x12xf32, #tpu.memory_space<vmem>>, vector<8x4xf32>
    tpu.vector_store %arg4[%c0_56, %c8_57], %152 {strides = array<i32>} : memref<8x12xf32, #tpu.memory_space<vmem>>, vector<8x4xf32>,
    return
  }
  func.func @transform_0(%arg0: i32) -> (i32, i32) {
    %c0_i32 = arith.constant 0 : i32
    %c0_i32_0 = arith.constant 0 : i32
    return %arg0, %c0_i32 : i32, i32
  }
  func.func @transform_1(%arg0: i32) -> (i32, i32) {
    %c0_i32 = arith.constant 0 : i32
    %c0_i32_0 = arith.constant 0 : i32
    return %arg0, %c0_i32 : i32, i32
  }
  func.func @transform_2(%arg0: i32) -> (i32, i32) {
    %c0_i32 = arith.constant 0 : i32
    %c0_i32_0 = arith.constant 0 : i32
    %c0_i32_1 = arith.constant 0 : i32
    return %c0_i32, %c0_i32_0 : i32, i32
  }
  func.func @transform_3(%arg0: i32) -> (i32, i32) {
    %c0_i32 = arith.constant 0 : i32
    %c0_i32_0 = arith.constant 0 : i32
    return %arg0, %c0_i32 : i32, i32
  }
}

</mosaic_0001>

<bundles_post_ra>
// kernel: finn_ssi_forward.1
= control target key start
LH: loop header
LB: loop body
LE: loop exit
PB: predicated region body
PF: predicated region fallthrough
CT: control target
= control target key end

     0   :  { %8 = vsyncpa [#allocation4], 0  ;;  %s2595_s15 = smov [#allocation3]   ;;  %s2596_s17 = smov 128   ;;  %s3019_s0 = inlined_call_operand.vmem [shape: f32[8,4], index: 0, kind: input, shape index: {}]   ;;  %s3020_s1 = inlined_call_operand.vmem [shape: f32[8,8], index: 1, kind: input, shape index: {}]   ;;  %s3021_s2 = inlined_call_operand.hbm [shape: f32[224,128], index: 2, kind: input, shape index: {}]   ;;  %s3022_s3 = inlined_call_operand.vmem [shape: f32[8,12], index: 3, kind: output, shape index: {}]  }
   0x1   :  { %s17_s14 = sshll.u32 %s3021_s2, 4  ;;  %s19_s16 = sshll.u32 %s2595_s15, 4  ;;  %s18_s14 = int_to_ptr.hbm [resolvable:$true] %s17_s14  ;;  %s20_s16 = int_to_ptr.vmem [resolvable:$true] %s19_s16 }
   0x2   :  { %s2597_s18 = smov 8  }
   0x3   :  { %25 = dma.hbm_to_vmem [thread:$0]  %s18_s14, 3584, %s20_s16, [#allocation4], %s2596_s17, %s2596_s17, %s2597_s18  }
   0x4   :  { %2593 = dma.done.wait [#allocation4], 3584  }
   0x5   :  { %2594 = vsyncadd [#allocation4], 4294963712  ;;  %vm60_vm0 = vcmask 64512   ;;  %vm214_vm1 = vcmask 1043456   ;;  %vm210_vm2 = vcmask 31744   ;;  %v33_v0 = vld [vmem:[#allocation3 + $0x8] sm:$0xff] }
   0x6   :  { %v2632_v1 = vld [vmem:[%s3020_s1] sm:$0xff]  ;;  %v32_v2 = vld [vmem:[#allocation3] sm:$0xf]  ;;  %v79_v3 = vand.u32 4294901760, %v33_v0  ;;  %v46_v29 = vld [vmem:[#allocation3 + $0x70] sm:$0xff]  ;;  %vm368_vm3 = vcmask 261120  }
   0x7   :  { %v62_v4 = vsel %vm60_vm0, %v2632_v1, 0  ;;  %v216_v5 = vsel %vm214_vm1, %v32_v2, 0  ;;  %v30_v6 = vld [vmem:[%s3019_s0] sm:$0xff]  ;;  %v386_v31 = vand.u32 4294901760, %v46_v29  ;;  %v45_v32 = vld [vmem:[#allocation3 + $0x68] sm:$0xff]  ;;  %v44_v36 = vld [vmem:[#allocation3 + $0x60] sm:$0xff] }
   0x8   :  { %v81_v7 = vand.u32 4294901760, %v62_v4  ;;  %v233_v8 = vand.u32 4294901760, %v216_v5  ;;  %v212_v9 = vsel %vm210_vm2, %v30_v6, 0  ;;  %v106_v10 = vsub.f32 %v33_v0, %v79_v3  ;;  %156 = vmatpush.msra.mxu3 %v79_v3  ;;  %80 = vmatpush.msra.mxu0 %v79_v3  ;;  %v47_v27 = vld [vmem:[#allocation3 + $0x78] sm:$0xff]  ;;  %v52_v48 = vld [vmem:[#allocation3 + $0xa0] sm:$0xff]  ;;  %v50_v56 = vld [vmem:[#allocation3 + $0x90] sm:$0xff] }
   0x9   :  { %v235_v11 = vand.u32 4294901760, %v212_v9  ;;  %v384_v28 = vand.u32 4294901760, %v47_v27  ;;  %v420_v34 = vsub.f32 %v46_v29, %v386_v31  ;;  %v388_v35 = vand.u32 4294901760, %v45_v32  ;;  %v51_v52 = vld [vmem:[#allocation3 + $0x98] sm:$0xff]  ;;  %v49_v62 = vld [vmem:[#allocation3 + $0x88] sm:$0xff] }
   0xa   :  { %v82_v12 = vsub.f32 %v62_v4, %v81_v7  ;;  %v260_v13 = vsub.f32 %v216_v5, %v233_v8  ;;  %133 = vmatpush.msra.mxu2 %v106_v10  ;;  %v107_v14 = vand.u32 4294901760, %v106_v10  ;;  %v390_v40 = vand.u32 4294901760, %v44_v36 }
   0xb   :  { %v236_v15 = vsub.f32 %v212_v9, %v235_v11  ;;  %v414_v30 = vsub.f32 %v47_v27, %v384_v28  ;;  %v421_v38 = vand.u32 4294901760, %v420_v34  ;;  %v426_v39 = vsub.f32 %v45_v32, %v388_v35 }
   0xc   :  { %136 = vmatmul.f32.vlgmr.msra.gmra.mxu2 %v82_v12  ;;  %v83_v16 = vand.u32 4294901760, %v82_v12  ;;  %v261_v17 = vand.u32 4294901760, %v260_v13  ;;  %v108_v18 = vsub.f32 %v106_v10, %v107_v14  ;;  %182 = vmatpush.msrb.mxu0 %v107_v14  ;;  %v432_v44 = vsub.f32 %v44_v36, %v390_v40 }
   0xd   :  { %234 = vmatpush.msrb.mxu2 %v233_v8  ;;  %v237_v19 = vand.u32 4294901760, %v236_v15  ;;  %v415_v33 = vand.u32 4294901760, %v414_v30  ;;  %v422_v42 = vsub.f32 %v420_v34, %v421_v38  ;;  %v427_v43 = vand.u32 4294901760, %v426_v39 }
   0xe   :  { %160 = vmatmul.f32.vlgmr.msra.gmra.mxu3 %v83_v16  ;;  %v84_v20 = vsub.f32 %v82_v12, %v83_v16  ;;  %v262_v21 = vsub.f32 %v260_v13, %v261_v17  ;;  %v109_v22 = vand.u32 4294901760, %v108_v18  ;;  %v433_v47 = vand.u32 4294901760, %v432_v44 }
   0xf   :  { %336 = vmatpush.msra.mxu2 %v261_v17  ;;  %v238_v23 = vsub.f32 %v236_v15, %v237_v19  ;;  %v416_v37 = vsub.f32 %v414_v30, %v415_v33  ;;  %v423_v45 = vand.u32 4294901760, %v422_v42  ;;  %v428_v46 = vsub.f32 %v426_v39, %v427_v43 }
  0x10   :  { %v85_v24 = vand.u32 4294901760, %v84_v20  ;;  %v263_v25 = vand.u32 4294901760, %v262_v21  ;;  %110 = vmatpush.msra.mxu1 %v109_v22  ;;  %v434_v50 = vsub.f32 %v432_v44, %v433_v47  ;;  %v2639_v51 = vand.u32 4294901760, %v52_v48 }
  0x11   :  { %v239_v26 = vand.u32 4294901760, %v238_v23  ;;  %112 = vmatmul.f32.vlgmr.msra.gmra.mxu1 %v81_v7  ;;  %v417_v41 = vand.u32 4294901760, %v416_v37  ;;  %v429_v49 = vand.u32 4294901760, %v428_v46  ;;  %v2645_v55 = vand.u32 4294901760, %v51_v52  ;;  %v2544_v37 = vld [vmem:[#allocation3 + $0x10] ss:$0 sm:$0xff] }
  0x12   :  { %86 = vmatmul.f32.vlgmr.msra.gmra.mxu0 %v85_v24  ;;  %264 = vmatpush.msrb.mxu3 %v263_v25  ;;  %v435_v53 = vand.u32 4294901760, %v434_v50  ;;  %v2643_v54 = vsub.f32 %v52_v48, %v2639_v51  ;;  %v2649_v58 = vand.u32 4294901760, %v50_v56  ;;  %v2659_v4 = vand.u32 4294901760, %v49_v62  ;;  %v36_v50 = vld [vmem:[#allocation3 + $0x20] sm:$0xff] }
  0x13   :  { %204 = vmatpush.msrb.mxu1 %v79_v3  ;;  %287 = vmatpush.msra.mxu0 %v260_v13  ;;  %v2652_v59 = vsub.f32 %v51_v52, %v2645_v55  ;;  %vm753_vm4 = vcmask 7168   ;;  %vm957_vm5 = vcmask 15368   ;;  %vm1159_vm6 = vcmask 23568  }
  0x14   :  { %240 = vmatmul.f32.vlgmr.msrb.gmra.mxu2 %v239_v26  ;;  %358 = vmatpush.msra.mxu3 %v233_v8  ;;  %v602_v57 = vand.u32 4294901760, %v2643_v54  ;;  %v2662_v6 = vsub.f32 %v50_v56, %v2649_v58  ;;  %v2669_v10 = vsub.f32 %v49_v62, %v2659_v4  ;;  %v35_v56 = vld [vmem:[#allocation3 + $0x18] sm:$0xff]  ;;  %vm1361_vm7 = vcmask 31768  }
  0x15   :  { %310 = vmatpush.msra.mxu1 %v233_v8  ;;  %456 = vmatpush.msrb.mxu2 %v414_v30  ;;  %v608_v3 = vand.u32 4294901760, %v2652_v59  ;;  %v40_v30 = vld [vmem:[#allocation3 + $0x40] sm:$0x1]  ;;  %vm1563_vm8 = vcmask 39968   ;;  %vm1765_vm9 = vcmask 48168   ;;  %vm1967_vm10 = vcmask 56368  }
  0x16   :  { %266 = vmatmul.f32.vlgmr.msrb.gmra.mxu3 %v235_v11  ;;  %v603_v2 = vsub.f32 %v2643_v54, %v602_v57  ;;  %v620_v13 = vand.u32 4294901760, %v2669_v10  ;;  %vm2169_vm11 = vcmask 64568   ;;  %vm2519_vm12 = vcmask 97344  }
  0x17   :  { %485 = vmatpush.msrb.mxu3 %v384_v28  ;;  %459 = vmatpush.msrb.mxu2 %v420_v34  ;;  %v609_v9 = vsub.f32 %v2652_v59, %v608_v3 }
  0x18   :  { %v604_v8 = vand.u32 4294901760, %v603_v2  ;;  %v621_v16 = vsub.f32 %v2669_v10, %v620_v13  ;;  %v2714_v2 = vand.u32 4294901760, %v35_v56 }
  0x19   :  { %206 = vmatmul.f32.vlgmr.msrb.gmra.mxu1 %v81_v7  ;;  %487 = vmatpush.msrb.mxu3 %v386_v31  ;;  %v610_v12 = vand.u32 4294901760, %v609_v9 }
  0x1a   :  { %184 = vmatmul.f32.vlgmr.msrb.gmra.mxu0 %v81_v7  ;;  %462 = vmatpush.msrb.mxu2 %v426_v39  ;;  %v622_v22 = vand.u32 4294901760, %v621_v16 }
  0x1b   :  { %385 = vmatpush.msrb.mxu0 %v384_v28  ;;  %489 = vmatpush.msrb.mxu3 %v388_v35 }
  0x1c   :  { %338 = vmatmul.f32.vlgmr.msra.gmra.mxu2 %v235_v11  ;;  %418 = vmatpush.msrb.mxu1 %v417_v41  ;;  %v37_v41 = vld [vmem:[#allocation3 + $0x28] sm:$0xff] }
  0x1d   :  { %387 = vmatpush.msrb.mxu0 %v386_v31  ;;  %491 = vmatpush.msrb.mxu3 %v390_v40  ;;  %v2684_v46 = vand.u32 4294901760, %v37_v41 }
  0x1e   :  { %360 = vmatmul.f32.vlgmr.msra.gmra.mxu3 %v235_v11  ;;  %465 = vmatpush.msrb.mxu2 %v432_v44  ;;  %v614_v11 = vand.u32 4294901760, %v2662_v6 }
  0x1f   :  { %389 = vmatpush.msrb.mxu0 %v388_v35  ;;  %424 = vmatpush.msrb.mxu1 %v423_v45  ;;  %v2693_v52 = vsub.f32 %v37_v41, %v2684_v46 }
  0x20   :  { %572 = vmatpush.msra.mxu2 %v2639_v51  ;;  %605 = vmatpush.msra.mxu3 %v604_v8  ;;  %v615_v14 = vsub.f32 %v2662_v6, %v614_v11 }
  0x21   :  { %314 = vmatmul.f32.vlgmr.msra.gmra.mxu1 %v237_v19  ;;  %391 = vmatpush.msrb.mxu0 %v390_v40 }
  0x22   :  { %290 = vmatmul.f32.vlgmr.msra.gmra.mxu0 %v236_v15  ;;  %430 = vmatpush.msrb.mxu1 %v429_v49  ;;  %v616_v19 = vand.u32 4294901760, %v615_v14 }
  0x23   :  { %514 = vmatpush.msra.mxu0 %v415_v33  ;;  %574 = vmatpush.msra.mxu2 %v2645_v55  ;;  %v38_v33 = vld [vmem:[#allocation3 + $0x30] sm:$0xff] }
  0x24   :  { %436 = vmatpush.msrb.mxu1 %v435_v53  ;;  %611 = vmatpush.msra.mxu3 %v610_v12  ;;  %v2679_v39 = vand.u32 4294901760, %v38_v33 }
  0x25   :  { %518 = vmatpush.msra.mxu0 %v421_v38  ;;  %576 = vmatpush.msra.mxu2 %v2649_v58  ;;  %v39_v38 = vld [vmem:[#allocation3 + $0x38] sm:$0x1] }
  0x26   :  { %545 = vmatpush.msra.mxu1 %v384_v28  ;;  %617 = vmatpush.msra.mxu3 %v616_v19  ;;  %v2682_v44 = vsub.f32 %v38_v33, %v2679_v39  ;;  %v2600_v19 = vmov 5  }
  0x27   :  { %522 = vmatpush.msra.mxu0 %v427_v43  ;;  %578 = vmatpush.msra.mxu2 %v2659_v4 }
  0x28   :  { %547 = vmatpush.msra.mxu1 %v386_v31  ;;  %623 = vmatpush.msra.mxu3 %v622_v22  ;;  %v2690_v49 = vand.u32 4294901760, %v2682_v44  ;;  %v2547_v22 = vld [vmem:[#allocation3 + $0x80] ss:$0 sm:$0xff] }
  0x29   :  { %526 = vmatpush.msra.mxu0 %v433_v47 }
  0x2a   :  { %549 = vmatpush.msra.mxu1 %v388_v35  ;;  %v744_v35 = vmul.f32 0.0, %v40_v30  ;;  %v2548_v30 = vld [vmem:[#allocation3 + $0xa8] ss:$0 sm:$0xff] }
  0x2c   :  { %551 = vmatpush.msra.mxu1 %v390_v40  ;;  %v745_v42 = vadd.f32 %v744_v35, %v39_v38 }
  0x2e   :  { %2553 = vtanh.f32 %v745_v42 }
  0x8e   :  { %v113_v61 = vpop.f32.mrf.mxu1 }
  0x8f   :  { %v87_v60 = vpop.f32.mrf.mxu0  ;;  %v137_v0 = vpop.f32.mrf.mxu2 }
  0x90   :  { %v114_v63 = vadd.f32 %v113_v61, %v87_v60  ;;  %v2700_v60 = vand.u32 4294901760, %v36_v50  ;;  %v2702_v61 = vpop.eup %2553 }
  0x91   :  { %v161_v5 = vpop.f32.mrf.mxu3  ;;  %v747_v8 = vperm.slane %v2702_v61, 0 }
  0x92   :  { %v138_v7 = vadd.f32 %v137_v0, %v114_v63  ;;  %v808_v63 = vsub.f32 %v2682_v44, %v2690_v49  ;;  %v2712_v0 = vand.u32 4294901760, %v2693_v52 }
  0x94   :  { %v162_v15 = vadd.f32 %v161_v5, %v138_v7  ;;  %v2721_v7 = vsub.f32 %v36_v50, %v2700_v60  ;;  %v814_v12 = vsub.f32 %v2693_v52, %v2712_v0 }
  0x96   :  { %v207_v18 = vpop.f32.mrf.mxu1  ;;  %v2742_v14 = vand.u32 4294901760, %v2721_v7 }
  0x97   :  { %v185_v17 = vpop.f32.mrf.mxu0  ;;  %v241_v21 = vpop.f32.mrf.mxu2 }
  0x98   :  { %v186_v20 = vadd.f32 %v185_v17, %v162_v15 }
  0x99   :  { %v267_v23 = vpop.f32.mrf.mxu3 }
  0x9a   :  { %v208_v24 = vadd.f32 %v207_v18, %v186_v20  ;;  %v2599_v18 = vmov 4   ;;  %v2601_v20 = vmov 1  }
  0x9b   :  { %2540 = vset.pattern.permute.xlu2 %v2599_v18  ;;  %v2602_v18 = vmov 2  }
  0x9c   :  { %v242_v25 = vadd.f32 %v241_v21, %v208_v24  ;;  %1566 = vperm.xlu2 %2540, %v2632_v1   ;;  %2538 = vset.pattern.permute.xlu1 %v2602_v18 }
  0x9d   :  { %1162 = vperm.xlu1 %2538, %v2632_v1  }
  0x9e   :  { %v268_v26 = vadd.f32 %v267_v23, %v242_v25  ;;  %v315_v28 = vpop.f32.mrf.mxu1 }
  0x9f   :  { %v291_v27 = vpop.f32.mrf.mxu0  ;;  %v339_v31 = vpop.f32.mrf.mxu2 }
  0xa0   :  { %v292_v29 = vadd.f32 %v291_v27, %v268_v26 }
  0xa1   :  { %v361_v34 = vpop.f32.mrf.mxu3 }
  0xa2   :  { %v316_v32 = vadd.f32 %v315_v28, %v292_v29 }
  0xa4   :  { %v340_v36 = vadd.f32 %v339_v31, %v316_v32  ;;  %2541 = vset.pattern.permute.xlu2 %v2600_v19 }
  0xa5   :  { %1768 = vperm.xlu2 %2541, %v2632_v1  }
  0xa6   :  { %v362_v40 = vadd.f32 %v361_v34, %v340_v36  ;;  %v2835_v36 = vld [vmem:[#allocation3 + $0x58] ss:$0 sm:$0xff] }
  0xa7   :  { %v749_v41 = vmul.f32 %v2835_v36, %v747_v8 }
  0xa8   :  { %v365_v43 = vadd.f32 %v2544_v37, %v362_v40 }
  0xaa   :  { %v366_v45 = vmax.f32 %v365_v43, 0.0  ;;  %v750_v43 = vsel %vm368_vm3, %v749_v41, 0.0 }
  0xac   :  { %v370_v47 = vsel %vm368_vm3, %v366_v45, 0 }
  0xad   :  { %v2687_v48 = vand.u32 4294901760, %v370_v47 }
  0xaf   :  { %v2696_v53 = vsub.f32 %v370_v47, %v2687_v48  ;;  %438 = vmatmul.f32.vlgmr.msrb.gmra.mxu1 %v2687_v48 }
  0xb0   :  { %672 = vmatpush.msrb.mxu1 %v2639_v51 }
  0xb1   :  { %468 = vmatmul.f32.vlgmr.msrb.gmra.mxu2 %v2696_v53  ;;  %v394_v62 = vand.u32 4294901760, %v2696_v53 }
  0xb2   :  { %674 = vmatpush.msrb.mxu1 %v2645_v55  ;;  %701 = vmatpush.msrb.mxu2 %v602_v57  ;;  %v2725_v57 = vand.u32 4294901760, %v808_v63 }
  0xb3   :  { %495 = vmatmul.f32.vlgmr.msrb.gmra.mxu3 %v394_v62  ;;  %v395_v5 = vsub.f32 %v2696_v53, %v394_v62 }
  0xb4   :  { %676 = vmatpush.msrb.mxu1 %v2649_v58  ;;  %705 = vmatpush.msrb.mxu2 %v608_v3  ;;  %v2733_v3 = vsub.f32 %v35_v56, %v2714_v2 }
  0xb5   :  { %v396_v9 = vand.u32 4294901760, %v395_v5  ;;  %732 = vmatpush.msrb.mxu3 %v2639_v51  ;;  %v762_v51 = vsel %vm368_vm3, %v747_v8, 0 }
  0xb6   :  { %678 = vmatpush.msrb.mxu1 %v2659_v4  ;;  %709 = vmatpush.msrb.mxu2 %v614_v11  ;;  %v2748_v11 = vand.u32 4294901760, %v814_v12 }
  0xb7   :  { %397 = vmatmul.f32.vlgmr.msrb.gmra.mxu0 %v396_v9  ;;  %553 = vmatmul.f32.vlgmr.msra.gmra.mxu1 %v2687_v48 }
  0xb8   :  { %734 = vmatpush.msrb.mxu3 %v2645_v55  ;;  %643 = vmatpush.msrb.mxu0 %v2643_v54  ;;  %v2751_v55 = vand.u32 4294901760, %v2733_v3  ;;  %v2755_v54 = vand.u32 4294901760, %v762_v51 }
  0xb9   :  { %584 = vmatmul.f32.vlgmr.msra.gmra.mxu2 %v396_v9  ;;  %810 = vmatpush.msra.mxu1 %v2725_v57 }
  0xba   :  { %713 = vmatpush.msrb.mxu2 %v620_v13  ;;  %736 = vmatpush.msrb.mxu3 %v2649_v58  ;;  %v820_v13 = vsub.f32 %v2721_v7, %v2742_v14  ;;  %v826_v58 = vsub.f32 %v2733_v3, %v2751_v55 }
  0xbb   :  { %625 = vmatmul.f32.vlgmr.msra.gmra.mxu3 %v2687_v48  ;;  %646 = vmatpush.msrb.mxu0 %v2652_v59  ;;  %v785_v59 = vsub.f32 %v762_v51, %v2755_v54  ;;  %v2847_v51 = vld [vmem:[#allocation3 + $0x40] ss:$0 sm:$0xff] }
  0xbc   :  { %738 = vmatpush.msrb.mxu3 %v2659_v4  ;;  %848 = vmatpush.msra.mxu2 %v2682_v44  ;;  %v2771_v4 = vand.u32 4294901760, %v820_v13 }
  0xbd   :  { %649 = vmatpush.msrb.mxu0 %v2662_v6  ;;  %816 = vmatpush.msra.mxu1 %v2748_v11  ;;  %v2777_v6 = vand.u32 4294901760, %v826_v58  ;;  %v786_v15 = vand.u32 4294901760, %v785_v59 }
  0xbe   :  { %877 = vmatpush.msra.mxu3 %v2679_v39  ;;  %851 = vmatpush.msra.mxu2 %v2693_v52 }
  0xbf   :  { %528 = vmatmul.f32.vlgmr.msra.gmra.mxu0 %v2687_v48  ;;  %682 = vmatmul.f32.vlgmr.msrb.gmra.mxu1 %v394_v62  ;;  %v787_v16 = vsub.f32 %v785_v59, %v786_v15 }
  0xc0   :  { %652 = vmatpush.msrb.mxu0 %v2669_v10  ;;  %854 = vmatpush.msra.mxu2 %v2721_v7  ;;  %v2598_v10 = vmov 0  }
  0xc1   :  { %715 = vmatmul.f32.vlgmr.msrb.gmra.mxu2 %v2687_v48  ;;  %879 = vmatpush.msra.mxu3 %v2684_v46  ;;  %v788_v17 = vand.u32 4294901760, %v787_v16  ;;  %v2850_v16 = vld [vmem:[#allocation3 + $0x38] ss:$0 sm:$0xff] }
  0xc2   :  { %777 = vmatpush.msra.mxu0 %v2679_v39  ;;  %857 = vmatpush.msra.mxu2 %v2733_v3 }
  0xc3   :  { %740 = vmatmul.f32.vlgmr.msrb.gmra.mxu3 %v2687_v48  ;;  %822 = vmatpush.msra.mxu1 %v2771_v4 }
  0xc4   :  { %779 = vmatpush.msra.mxu0 %v2684_v46  ;;  %881 = vmatpush.msra.mxu3 %v2700_v60 }
  0xc5   :  { %2536 = vset.pattern.permute.xlu0 %v2598_v10  ;;  %828 = vmatpush.msra.mxu1 %v2777_v6 }
  0xc6   :  { %781 = vmatpush.msra.mxu0 %v2700_v60  ;;  %883 = vmatpush.msra.mxu3 %v2714_v2 }
  0xc7   :  { %655 = vmatmul.f32.vlgmr.msrb.gmra.mxu0 %v2696_v53  ;;  %830 = vmatmul.f32.vlgmr.msra.gmra.mxu1 %v2755_v54 }
  0xc8   :  { %783 = vmatpush.msra.mxu0 %v2714_v2  ;;  %937 = vmatpush.msrb.mxu1 %v2679_v39 }
  0xc9   :  { %860 = vmatmul.f32.vlgmr.msra.gmra.mxu2 %v785_v59  ;;  %756 = vperm.xlu0 %2536, %v2632_v1  }
  0xca   :  { %906 = vmatpush.msrb.mxu0 %v2690_v49  ;;  %939 = vmatpush.msrb.mxu1 %v2684_v46 }
  0xcb   :  { %887 = vmatmul.f32.vlgmr.msra.gmra.mxu3 %v786_v15  ;;  %980 = vmatpush.msrb.mxu2 %v2679_v39 }
  0xcc   :  { %910 = vmatpush.msrb.mxu0 %v2712_v0  ;;  %941 = vmatpush.msrb.mxu1 %v2700_v60 }
  0xcd   :  { %1013 = vmatpush.msrb.mxu3 %v2725_v57  ;;  %982 = vmatpush.msrb.mxu2 %v2684_v46 }
  0xce   :  { %914 = vmatpush.msrb.mxu0 %v2742_v14  ;;  %943 = vmatpush.msrb.mxu1 %v2714_v2 }
  0xcf   :  { %1019 = vmatpush.msrb.mxu3 %v2748_v11  ;;  %789 = vmatmul.f32.vlgmr.msra.gmra.mxu0 %v788_v17 }
  0xd0   :  { %945 = vmatmul.f32.vlgmr.msrb.gmra.mxu1 %v2755_v54  ;;  %918 = vmatpush.msrb.mxu0 %v2751_v55 }
  0xd1   :  { %1025 = vmatpush.msrb.mxu3 %v2771_v4  ;;  %1080 = vmatpush.msra.mxu1 %v2679_v39 }
  0xd2   :  { %1051 = vmatpush.msra.mxu0 %v2682_v44  ;;  %984 = vmatpush.msrb.mxu2 %v2700_v60 }
  0xd3   :  { %1031 = vmatpush.msrb.mxu3 %v2777_v6  ;;  %1082 = vmatpush.msra.mxu1 %v2684_v46 }
  0xd4   :  { %1054 = vmatpush.msra.mxu0 %v2693_v52  ;;  %986 = vmatpush.msrb.mxu2 %v2714_v2 }
  0xd5   :  { %1140 = vmatpush.msra.mxu3 %v2679_v39  ;;  %1084 = vmatpush.msra.mxu1 %v2700_v60 }
  0xd6   :  { %1057 = vmatpush.msra.mxu0 %v2721_v7  ;;  %1109 = vmatpush.msra.mxu2 %v2690_v49 }
  0xd7   :  { %1142 = vmatpush.msra.mxu3 %v2684_v46  ;;  %920 = vmatmul.f32.vlgmr.msrb.gmra.mxu0 %v2755_v54 }
  0xd8   :  { %1086 = vmatpush.msra.mxu1 %v2714_v2  ;;  %1060 = vmatpush.msra.mxu0 %v2733_v3 }
  0xd9   :  { %1144 = vmatpush.msra.mxu3 %v2700_v60  ;;  %1113 = vmatpush.msra.mxu2 %v2712_v0 }
  0xda   :  { %1215 = vmatpush.msrb.mxu1 %v2725_v57  ;;  %1182 = vmatpush.msrb.mxu0 %v2679_v39 }
  0xdb   :  { %1146 = vmatpush.msra.mxu3 %v2714_v2  ;;  %1117 = vmatpush.msra.mxu2 %v2742_v14 }
  0xdc   :  { %1221 = vmatpush.msrb.mxu1 %v2748_v11  ;;  %1184 = vmatpush.msrb.mxu0 %v2684_v46 }
  0xdd   :  { %1121 = vmatpush.msra.mxu2 %v2751_v55  ;;  %2537 = vset.pattern.permute.xlu0 %v2601_v20 }
  0xde   :  { %1227 = vmatpush.msrb.mxu1 %v2771_v4  ;;  %1186 = vmatpush.msrb.mxu0 %v2700_v60 }
  0xdf   :  { %960 = vperm.xlu0 %2537, %v2632_v1   ;;  %751 = vadd.xlane.f32.xlu2 %v750_v43 }
  0xe0   :  { %1233 = vmatpush.msrb.mxu1 %v2777_v6  ;;  %1188 = vmatpush.msrb.mxu0 %v2714_v2 }
 0x12c   :  { %v439_v21 = vpop.f32.mrf.mxu1 }
 0x134   :  { %v398_v23 = vpop.f32.mrf.mxu0  ;;  %v469_v24 = vpop.f32.mrf.mxu2 }
 0x135   :  { %v399_v25 = vadd.f32 %v2547_v22, %v398_v23  ;;  %v554_v28 = vpop.f32.mrf.mxu1 }
 0x136   :  { %v496_v26 = vpop.f32.mrf.mxu3 }
 0x137   :  { %v440_v27 = vadd.f32 %v439_v21, %v399_v25 }
 0x139   :  { %v470_v29 = vadd.f32 %v469_v24, %v440_v27 }
 0x13b   :  { %v497_v31 = vadd.f32 %v496_v26, %v470_v29  ;;  %v757_v54 = vpop.permute.xlu0 %756 }
 0x13c   :  { %v529_v32 = vpop.f32.mrf.mxu0  ;;  %v585_v33 = vpop.f32.mrf.mxu2  ;;  %v760_v10 = vmul.f32 %v2847_v51, %v757_v54 }
 0x13d   :  { %v530_v34 = vadd.f32 %v529_v32, %v497_v31  ;;  %v586_v35 = vadd.f32 %v2548_v30, %v585_v33  ;;  %v683_v42 = vpop.f32.mrf.mxu1  ;;  %v2603_v30 = vmov 3   ;;  %v2882_v31 = vpop.permute.xlu2 %1566 }
 0x13e   :  { %v626_v37 = vpop.f32.mrf.mxu3  ;;  %2539 = vset.pattern.permute.xlu1 %v2603_v30 }
 0x13f   :  { %v555_v38 = vadd.f32 %v554_v28, %v530_v34  ;;  %v627_v40 = vadd.f32 %v626_v37, %v586_v35  ;;  %1364 = vperm.xlu1 %2539, %v2632_v1   ;;  %v2604_v34 = vmov 6  }
 0x140   :  { %2543 = vset.pattern.permute.xlu0 %v2604_v34 }
 0x141   :  { %557 = vst.msk [vmem:[%s3022_s3] sm:$0xff] %vm60_vm0, %v555_v38 }
 0x144   :  { %v656_v45 = vpop.f32.mrf.mxu0  ;;  %v716_v47 = vpop.f32.mrf.mxu2 }
 0x145   :  { %v657_v48 = vadd.f32 %v656_v45, %v627_v40  ;;  %v831_v62 = vpop.f32.mrf.mxu1  ;;  %v2884_v32 = vpop.permute.xlu2 %1768 }
 0x146   :  { %v741_v53 = vpop.f32.mrf.mxu3 }
 0x147   :  { %v684_v50 = vadd.f32 %v683_v42, %v657_v48  ;;  %2542 = vset.pattern.permute.xlu1 %v2604_v34 }
 0x148   :  { %1970 = vperm.xlu1 %2542, %v2632_v1  }
 0x149   :  { %v717_v56 = vadd.f32 %v716_v47, %v684_v50 }
 0x14b   :  { %v2845_v63 = vadd.f32 %v741_v53, %v717_v56 }
 0x14c   :  { %v790_v61 = vpop.f32.mrf.mxu0  ;;  %v861_v5 = vpop.f32.mrf.mxu2 }
 0x14d   :  { %v832_v8 = vadd.f32 %v831_v62, %v790_v61  ;;  %v946_v59 = vpop.f32.mrf.mxu1 }
 0x14e   :  { %v888_v12 = vpop.f32.mrf.mxu3 }
 0x14f   :  { %v862_v9 = vadd.f32 %v861_v5, %v832_v8 }
 0x151   :  { %v889_v13 = vadd.f32 %v888_v12, %v862_v9  ;;  %v961_v35 = vpop.permute.xlu0 %960 }
 0x152   :  { %v752_v33 = vpop.xlane.xlu2 %751  ;;  %v963_v50 = vmul.f32 %v2847_v51, %v961_v35 }
 0x153   :  { %754 = vst.msk [vmem:[#allocation2] sm:$0xff] %vm753_vm4, %v752_v33 }
 0x154   :  { %v921_v58 = vpop.f32.mrf.mxu0 }
 0x155   :  { %v922_v15 = vadd.f32 %v921_v58, %v889_v13 }
 0x157   :  { %v947_v17 = vadd.f32 %v946_v59, %v922_v15 }
 0x159   :  { %v949_v19 = vadd.f32 %v947_v17, %v760_v10  ;;  %v1163_v10 = vpop.permute.xlu1 %1162 }
 0x15b   :  { %v951_v20 = vadd.f32 %v2850_v16, %v949_v19 }
 0x15d   :  { %2555 = vtanh.f32 %v951_v20 }
 0x163   :  { %v2556_v21 = vpop.eup %2555 }
 0x164   :  { %v965_v22 = vsel %vm368_vm3, %v2556_v21, 0  ;;  %v953_v23 = vmul.f32 %v2556_v21, %v2835_v36 }
 0x165   :  { %v987_v24 = vand.u32 4294901760, %v965_v22 }
 0x166   :  { %v954_v25 = vsel %vm368_vm3, %v953_v23, 0.0 }
 0x167   :  { %1033 = vmatmul.f32.vlgmr.msrb.gmra.mxu3 %v987_v24  ;;  %955 = vadd.xlane.f32.xlu0 %v954_v25  ;;  %v988_v26 = vsub.f32 %v965_v22, %v987_v24 }
 0x168   :  { %1282 = vmatpush.msrb.mxu3 %v2679_v39 }
 0x169   :  { %1063 = vmatmul.f32.vlgmr.msra.gmra.mxu0 %v988_v26  ;;  %v989_v27 = vand.u32 4294901760, %v988_v26 }
 0x16a   :  { %1284 = vmatpush.msrb.mxu3 %v2684_v46  ;;  %1311 = vmatpush.msra.mxu0 %v2690_v49 }
 0x16b   :  { %1090 = vmatmul.f32.vlgmr.msra.gmra.mxu1 %v989_v27  ;;  %v990_v28 = vsub.f32 %v988_v26, %v989_v27 }
 0x16c   :  { %1286 = vmatpush.msrb.mxu3 %v2700_v60  ;;  %1342 = vmatpush.msra.mxu1 %v2679_v39 }
 0x16d   :  { %v991_v29 = vand.u32 4294901760, %v990_v28  ;;  %1315 = vmatpush.msra.mxu0 %v2712_v0  ;;  %v1165_v28 = vmul.f32 %v2847_v51, %v1163_v10 }
 0x16e   :  { %1288 = vmatpush.msrb.mxu3 %v2714_v2  ;;  %1344 = vmatpush.msra.mxu1 %v2684_v46 }
 0x16f   :  { %992 = vmatmul.f32.vlgmr.msrb.gmra.mxu2 %v991_v29  ;;  %1148 = vmatmul.f32.vlgmr.msra.gmra.mxu3 %v987_v24 }
 0x170   :  { %1253 = vmatpush.msrb.mxu2 %v2682_v44  ;;  %1346 = vmatpush.msra.mxu1 %v2700_v60 }
 0x171   :  { %1319 = vmatpush.msra.mxu0 %v2742_v14  ;;  %1417 = vmatpush.msra.mxu3 %v2725_v57 }
 0x172   :  { %1256 = vmatpush.msrb.mxu2 %v2693_v52  ;;  %1348 = vmatpush.msra.mxu1 %v2714_v2 }
 0x173   :  { %1323 = vmatpush.msra.mxu0 %v2751_v55  ;;  %1423 = vmatpush.msra.mxu3 %v2748_v11 }
 0x174   :  { %1259 = vmatpush.msrb.mxu2 %v2721_v7 }
 0x175   :  { %1429 = vmatpush.msra.mxu3 %v2771_v4 }
 0x176   :  { %1262 = vmatpush.msrb.mxu2 %v2733_v3 }
 0x177   :  { %1123 = vmatmul.f32.vlgmr.msra.gmra.mxu2 %v987_v24  ;;  %1435 = vmatpush.msra.mxu3 %v2777_v6 }
 0x178   :  { %1384 = vmatpush.msra.mxu2 %v2679_v39 }
 0x17a   :  { %1386 = vmatpush.msra.mxu2 %v2684_v46 }
 0x17c   :  { %1388 = vmatpush.msra.mxu2 %v2700_v60 }
 0x17e   :  { %1390 = vmatpush.msra.mxu2 %v2714_v2 }
 0x1b1   :  { %v2916_v17 = vpop.permute.xlu1 %1364 }
 0x1ba   :  { %v2918_v18 = vpop.permute.xlu1 %1970 }
 0x1da   :  { %v956_v37 = vpop.xlane.xlu0 %955 }
 0x1db   :  { %958 = vst.msk [vmem:[#allocation2] sm:$0xff] %vm957_vm5, %v956_v37 }
 0x1e6   :  { %v1064_v42 = vpop.f32.mrf.mxu0 }
 0x1e8   :  { %v1091_v45 = vpop.f32.mrf.mxu1 }
 0x1ea   :  { %v1034_v38 = vpop.f32.mrf.mxu3 }
 0x1f2   :  { %v993_v40 = vpop.f32.mrf.mxu2  ;;  %v1149_v56 = vpop.f32.mrf.mxu3 }
 0x1f3   :  { %v1035_v41 = vadd.f32 %v1034_v38, %v993_v40 }
 0x1f5   :  { %v1065_v43 = vadd.f32 %v1064_v42, %v1035_v41 }
 0x1f7   :  { %v1092_v47 = vadd.f32 %v1091_v45, %v1065_v43 }
 0x1fa   :  { %v1124_v48 = vpop.f32.mrf.mxu2 }
 0x1fb   :  { %v1125_v53 = vadd.f32 %v1124_v48, %v1092_v47 }
 0x1fd   :  { %v1150_v62 = vadd.f32 %v1149_v56, %v1125_v53 }
 0x1ff   :  { %v1152_v61 = vadd.f32 %v1150_v62, %v963_v50 }
 0x201   :  { %v1153_v1 = vadd.f32 %v2850_v16, %v1152_v61 }
 0x203   :  { %2557 = vtanh.f32 %v1153_v1 }
 0x209   :  { %v2558_v5 = vpop.eup %2557 }
 0x20a   :  { %v1167_v8 = vsel %vm368_vm3, %v2558_v5, 0  ;;  %v1155_v9 = vmul.f32 %v2558_v5, %v2835_v36 }
 0x20b   :  { %v1189_v12 = vand.u32 4294901760, %v1167_v8 }
 0x20c   :  { %v1156_v54 = vsel %vm368_vm3, %v1155_v9, 0.0 }
 0x20d   :  { %1235 = vmatmul.f32.vlgmr.msrb.gmra.mxu1 %v1189_v12  ;;  %1157 = vadd.xlane.f32.xlu1 %v1156_v54  ;;  %v1190_v13 = vsub.f32 %v1167_v8, %v1189_v12 }
 0x20e   :  { %1484 = vmatpush.msrb.mxu1 %v2679_v39 }
 0x20f   :  { %1265 = vmatmul.f32.vlgmr.msrb.gmra.mxu2 %v1190_v13  ;;  %v1191_v58 = vand.u32 4294901760, %v1190_v13 }
 0x210   :  { %1486 = vmatpush.msrb.mxu1 %v2684_v46  ;;  %1513 = vmatpush.msrb.mxu2 %v2690_v49 }
 0x211   :  { %1292 = vmatmul.f32.vlgmr.msrb.gmra.mxu3 %v1191_v58  ;;  %v1192_v59 = vsub.f32 %v1190_v13, %v1191_v58 }
 0x212   :  { %1488 = vmatpush.msrb.mxu1 %v2700_v60  ;;  %1544 = vmatpush.msrb.mxu3 %v2679_v39 }
 0x213   :  { %v1193_v15 = vand.u32 4294901760, %v1192_v59  ;;  %1517 = vmatpush.msrb.mxu2 %v2712_v0 }
 0x214   :  { %1490 = vmatpush.msrb.mxu1 %v2714_v2  ;;  %1546 = vmatpush.msrb.mxu3 %v2684_v46 }
 0x215   :  { %1194 = vmatmul.f32.vlgmr.msrb.gmra.mxu0 %v1193_v15  ;;  %1350 = vmatmul.f32.vlgmr.msra.gmra.mxu1 %v1189_v12 }
 0x216   :  { %1455 = vmatpush.msrb.mxu0 %v2682_v44  ;;  %1548 = vmatpush.msrb.mxu3 %v2700_v60 }
 0x217   :  { %1521 = vmatpush.msrb.mxu2 %v2742_v14  ;;  %1619 = vmatpush.msra.mxu1 %v2725_v57 }
 0x218   :  { %1458 = vmatpush.msrb.mxu0 %v2693_v52  ;;  %1550 = vmatpush.msrb.mxu3 %v2714_v2 }
 0x219   :  { %1525 = vmatpush.msrb.mxu2 %v2751_v55  ;;  %1625 = vmatpush.msra.mxu1 %v2748_v11 }
 0x21a   :  { %1461 = vmatpush.msrb.mxu0 %v2721_v7 }
 0x21b   :  { %1631 = vmatpush.msra.mxu1 %v2771_v4 }
 0x21c   :  { %1464 = vmatpush.msrb.mxu0 %v2733_v3 }
 0x21d   :  { %1325 = vmatmul.f32.vlgmr.msra.gmra.mxu0 %v1189_v12  ;;  %1637 = vmatpush.msra.mxu1 %v2777_v6  ;;  %v1367_v12 = vmul.f32 %v2847_v51, %v2916_v17 }
 0x21e   :  { %1586 = vmatpush.msra.mxu0 %v2679_v39 }
 0x220   :  { %1588 = vmatpush.msra.mxu0 %v2684_v46 }
 0x222   :  { %1590 = vmatpush.msra.mxu0 %v2700_v60 }
 0x224   :  { %1592 = vmatpush.msra.mxu0 %v2714_v2 }
 0x280   :  { %v1158_v19 = vpop.xlane.xlu1 %1157 }
 0x281   :  { %1160 = vst.msk [vmem:[#allocation2] sm:$0xff] %vm1159_vm6, %v1158_v19 }
 0x28a   :  { %v1236_v20 = vpop.f32.mrf.mxu1 }
 0x292   :  { %v1195_v21 = vpop.f32.mrf.mxu0  ;;  %v1266_v23 = vpop.f32.mrf.mxu2 }
 0x293   :  { %v1237_v22 = vadd.f32 %v1236_v20, %v1195_v21  ;;  %v1351_v30 = vpop.f32.mrf.mxu1 }
 0x294   :  { %v1293_v25 = vpop.f32.mrf.mxu3 }
 0x295   :  { %v1267_v24 = vadd.f32 %v1266_v23, %v1237_v22 }
 0x297   :  { %v1294_v26 = vadd.f32 %v1293_v25, %v1267_v24 }
 0x29a   :  { %v1326_v27 = vpop.f32.mrf.mxu0 }
 0x29b   :  { %v1327_v29 = vadd.f32 %v1326_v27, %v1294_v26 }
 0x29d   :  { %v1352_v33 = vadd.f32 %v1351_v30, %v1327_v29 }
 0x29f   :  { %v1354_v34 = vadd.f32 %v1352_v33, %v1165_v28 }
 0x2a1   :  { %v1355_v35 = vadd.f32 %v2850_v16, %v1354_v34 }
 0x2a3   :  { %2559 = vtanh.f32 %v1355_v35 }
 0x2a9   :  { %v2560_v37 = vpop.eup %2559 }
 0x2aa   :  { %v1369_v38 = vsel %vm368_vm3, %v2560_v37, 0  ;;  %v1357_v40 = vmul.f32 %v2560_v37, %v2835_v36 }
 0x2ab   :  { %v1391_v41 = vand.u32 4294901760, %v1369_v38 }
 0x2ac   :  { %v1358_v42 = vsel %vm368_vm3, %v1357_v40, 0.0 }
 0x2ad   :  { %1437 = vmatmul.f32.vlgmr.msra.gmra.mxu3 %v1391_v41  ;;  %1359 = vadd.xlane.f32.xlu2 %v1358_v42  ;;  %v1392_v43 = vsub.f32 %v1369_v38, %v1391_v41 }
 0x2ae   :  { %1686 = vmatpush.msra.mxu3 %v2679_v39 }
 0x2af   :  { %1467 = vmatmul.f32.vlgmr.msrb.gmra.mxu0 %v1392_v43  ;;  %v1393_v45 = vand.u32 4294901760, %v1392_v43 }
 0x2b0   :  { %1688 = vmatpush.msra.mxu3 %v2684_v46  ;;  %1715 = vmatpush.msrb.mxu0 %v2690_v49 }
 0x2b1   :  { %1494 = vmatmul.f32.vlgmr.msrb.gmra.mxu1 %v1393_v45  ;;  %v1394_v47 = vsub.f32 %v1392_v43, %v1393_v45 }
 0x2b2   :  { %1690 = vmatpush.msra.mxu3 %v2700_v60  ;;  %1746 = vmatpush.msrb.mxu1 %v2679_v39 }
 0x2b3   :  { %v1395_v48 = vand.u32 4294901760, %v1394_v47  ;;  %1719 = vmatpush.msrb.mxu0 %v2712_v0 }
 0x2b4   :  { %1692 = vmatpush.msra.mxu3 %v2714_v2  ;;  %1748 = vmatpush.msrb.mxu1 %v2684_v46 }
 0x2b5   :  { %1396 = vmatmul.f32.vlgmr.msra.gmra.mxu2 %v1395_v48  ;;  %1552 = vmatmul.f32.vlgmr.msrb.gmra.mxu3 %v1391_v41 }
 0x2b6   :  { %1657 = vmatpush.msra.mxu2 %v2682_v44  ;;  %1750 = vmatpush.msrb.mxu1 %v2700_v60 }
 0x2b7   :  { %1723 = vmatpush.msrb.mxu0 %v2742_v14  ;;  %1821 = vmatpush.msrb.mxu3 %v2725_v57 }
 0x2b8   :  { %1660 = vmatpush.msra.mxu2 %v2693_v52  ;;  %1752 = vmatpush.msrb.mxu1 %v2714_v2 }
 0x2b9   :  { %1727 = vmatpush.msrb.mxu0 %v2751_v55  ;;  %1827 = vmatpush.msrb.mxu3 %v2748_v11 }
 0x2ba   :  { %1663 = vmatpush.msra.mxu2 %v2721_v7 }
 0x2bb   :  { %1833 = vmatpush.msrb.mxu3 %v2771_v4 }
 0x2bc   :  { %1666 = vmatpush.msra.mxu2 %v2733_v3 }
 0x2bd   :  { %1527 = vmatmul.f32.vlgmr.msrb.gmra.mxu2 %v1391_v41  ;;  %1839 = vmatpush.msrb.mxu3 %v2777_v6 }
 0x2be   :  { %1788 = vmatpush.msrb.mxu2 %v2679_v39 }
 0x2c0   :  { %1790 = vmatpush.msrb.mxu2 %v2684_v46 }
 0x2c2   :  { %1792 = vmatpush.msrb.mxu2 %v2700_v60 }
 0x2c4   :  { %1794 = vmatpush.msrb.mxu2 %v2714_v2 }
 0x320   :  { %v1360_v50 = vpop.xlane.xlu2 %1359 }
 0x321   :  { %1362 = vst.msk [vmem:[#allocation2] sm:$0xff] %vm1361_vm7, %v1360_v50 }
 0x32c   :  { %v1468_v61 = vpop.f32.mrf.mxu0 }
 0x32e   :  { %v1495_v5 = vpop.f32.mrf.mxu1 }
 0x330   :  { %v1438_v53 = vpop.f32.mrf.mxu3 }
 0x338   :  { %v1397_v56 = vpop.f32.mrf.mxu2  ;;  %v1553_v13 = vpop.f32.mrf.mxu3 }
 0x339   :  { %v1439_v62 = vadd.f32 %v1438_v53, %v1397_v56 }
 0x33b   :  { %v1469_v1 = vadd.f32 %v1468_v61, %v1439_v62 }
 0x33d   :  { %v1496_v8 = vadd.f32 %v1495_v5, %v1469_v1 }
 0x340   :  { %v1528_v9 = vpop.f32.mrf.mxu2 }
 0x341   :  { %v1529_v54 = vadd.f32 %v1528_v9, %v1496_v8 }
 0x343   :  { %v1554_v58 = vadd.f32 %v1553_v13, %v1529_v54 }
 0x345   :  { %v1556_v59 = vadd.f32 %v1554_v58, %v1367_v12 }
 0x347   :  { %v1557_v15 = vadd.f32 %v2850_v16, %v1556_v59 }
 0x349   :  { %2561 = vtanh.f32 %v1557_v15 }
 0x34f   :  { %v2562_v10 = vpop.eup %2561 }
 0x350   :  { %v1571_v19 = vsel %vm368_vm3, %v2562_v10, 0  ;;  %v1559_v20 = vmul.f32 %v2562_v10, %v2835_v36 }
 0x351   :  { %v1593_v21 = vand.u32 4294901760, %v1571_v19 }
 0x352   :  { %v1560_v22 = vsel %vm368_vm3, %v1559_v20, 0.0 }
 0x353   :  { %1639 = vmatmul.f32.vlgmr.msra.gmra.mxu1 %v1593_v21  ;;  %1561 = vadd.xlane.f32.xlu2 %v1560_v22  ;;  %v1594_v23 = vsub.f32 %v1571_v19, %v1593_v21 }
 0x354   :  { %1888 = vmatpush.msra.mxu1 %v2679_v39 }
 0x355   :  { %1669 = vmatmul.f32.vlgmr.msra.gmra.mxu2 %v1594_v23  ;;  %v1595_v17 = vand.u32 4294901760, %v1594_v23 }
 0x356   :  { %1890 = vmatpush.msra.mxu1 %v2684_v46  ;;  %1917 = vmatpush.msra.mxu2 %v2690_v49 }
 0x357   :  { %1696 = vmatmul.f32.vlgmr.msra.gmra.mxu3 %v1595_v17  ;;  %v1596_v24 = vsub.f32 %v1594_v23, %v1595_v17 }
 0x358   :  { %1892 = vmatpush.msra.mxu1 %v2700_v60  ;;  %1948 = vmatpush.msra.mxu3 %v2679_v39 }
 0x359   :  { %v1597_v25 = vand.u32 4294901760, %v1596_v24  ;;  %1921 = vmatpush.msra.mxu2 %v2712_v0  ;;  %v1973_v24 = vmul.f32 %v2847_v51, %v2918_v18 }
 0x35a   :  { %1894 = vmatpush.msra.mxu1 %v2714_v2  ;;  %1950 = vmatpush.msra.mxu3 %v2684_v46 }
 0x35b   :  { %1598 = vmatmul.f32.vlgmr.msra.gmra.mxu0 %v1597_v25  ;;  %1754 = vmatmul.f32.vlgmr.msrb.gmra.mxu1 %v1593_v21 }
 0x35c   :  { %1859 = vmatpush.msra.mxu0 %v2682_v44  ;;  %1952 = vmatpush.msra.mxu3 %v2700_v60 }
 0x35d   :  { %1925 = vmatpush.msra.mxu2 %v2742_v14  ;;  %2023 = vmatpush.msrb.mxu1 %v2725_v57 }
 0x35e   :  { %1862 = vmatpush.msra.mxu0 %v2693_v52  ;;  %1954 = vmatpush.msra.mxu3 %v2714_v2 }
 0x35f   :  { %1929 = vmatpush.msra.mxu2 %v2751_v55  ;;  %2029 = vmatpush.msrb.mxu1 %v2748_v11 }
 0x360   :  { %1865 = vmatpush.msra.mxu0 %v2721_v7 }
 0x361   :  { %2035 = vmatpush.msrb.mxu1 %v2771_v4 }
 0x362   :  { %1868 = vmatpush.msra.mxu0 %v2733_v3 }
 0x363   :  { %1729 = vmatmul.f32.vlgmr.msrb.gmra.mxu0 %v1593_v21  ;;  %2041 = vmatpush.msrb.mxu1 %v2777_v6  ;;  %v1569_v6 = vmul.f32 %v2847_v51, %v2882_v31 }
 0x364   :  { %1990 = vmatpush.msrb.mxu0 %v2679_v39 }
 0x366   :  { %1992 = vmatpush.msrb.mxu0 %v2684_v46 }
 0x368   :  { %1994 = vmatpush.msrb.mxu0 %v2700_v60 }
 0x36a   :  { %1996 = vmatpush.msrb.mxu0 %v2714_v2 }
 0x3c6   :  { %v1562_v57 = vpop.xlane.xlu2 %1561 }
 0x3c7   :  { %1564 = vst.msk [vmem:[#allocation2] sm:$0xff] %vm1563_vm8, %v1562_v57 }
 0x3d0   :  { %v1640_v11 = vpop.f32.mrf.mxu1 }
 0x3d8   :  { %v1599_v26 = vpop.f32.mrf.mxu0  ;;  %v1670_v4 = vpop.f32.mrf.mxu2 }
 0x3d9   :  { %v1641_v27 = vadd.f32 %v1640_v11, %v1599_v26  ;;  %v1755_v35 = vpop.f32.mrf.mxu1 }
 0x3da   :  { %v1697_v29 = vpop.f32.mrf.mxu3 }
 0x3db   :  { %v1671_v28 = vadd.f32 %v1670_v4, %v1641_v27 }
 0x3dd   :  { %v1698_v30 = vadd.f32 %v1697_v29, %v1671_v28 }
 0x3e0   :  { %v1730_v33 = vpop.f32.mrf.mxu0 }
 0x3e1   :  { %v1731_v34 = vadd.f32 %v1730_v33, %v1698_v30  ;;  %v42_v30 = vld [vmem:[#allocation3 + $0x48] sm:$0xff] }
 0x3e2   :  { %v2194_v33 = vand.u32 4294901760, %v42_v30 }
 0x3e3   :  { %v1756_v37 = vadd.f32 %v1755_v35, %v1731_v34  ;;  %v2550_v35 = vld [vmem:[#allocation3 + $0xb0] ss:$0 sm:$0xff] }
 0x3e5   :  { %v1758_v38 = vadd.f32 %v1756_v37, %v1569_v6  ;;  %v2221_v6 = vsub.f32 %v42_v30, %v2194_v33 }
 0x3e7   :  { %v1759_v40 = vadd.f32 %v2850_v16, %v1758_v38  ;;  %v2222_v34 = vand.u32 4294901760, %v2221_v6 }
 0x3e9   :  { %2563 = vtanh.f32 %v1759_v40 }
 0x3ef   :  { %v2564_v41 = vpop.eup %2563 }
 0x3f0   :  { %v1773_v42 = vsel %vm368_vm3, %v2564_v41, 0  ;;  %v1761_v43 = vmul.f32 %v2564_v41, %v2835_v36 }
 0x3f1   :  { %v1795_v45 = vand.u32 4294901760, %v1773_v42 }
 0x3f2   :  { %v1762_v47 = vsel %vm368_vm3, %v1761_v43, 0.0 }
 0x3f3   :  { %1841 = vmatmul.f32.vlgmr.msrb.gmra.mxu3 %v1795_v45  ;;  %1763 = vadd.xlane.f32.xlu0 %v1762_v47  ;;  %v1796_v48 = vsub.f32 %v1773_v42, %v1795_v45 }
 0x3f4   :  { %2090 = vmatpush.msrb.mxu3 %v2679_v39 }
 0x3f5   :  { %1871 = vmatmul.f32.vlgmr.msra.gmra.mxu0 %v1796_v48  ;;  %v1797_v31 = vand.u32 4294901760, %v1796_v48 }
 0x3f6   :  { %2092 = vmatpush.msrb.mxu3 %v2684_v46  ;;  %2119 = vmatpush.msra.mxu0 %v2690_v49 }
 0x3f7   :  { %1898 = vmatmul.f32.vlgmr.msra.gmra.mxu1 %v1797_v31  ;;  %v1798_v50 = vsub.f32 %v1796_v48, %v1797_v31  ;;  %v58_v48 = vld [vmem:[#allocation3 + $0xd0] sm:$0xff] }
 0x3f8   :  { %2094 = vmatpush.msrb.mxu3 %v2700_v60  ;;  %2150 = vmatpush.msra.mxu1 %v2679_v39  ;;  %v2342_v31 = vand.u32 4294901760, %v58_v48 }
 0x3f9   :  { %v1799_v53 = vand.u32 4294901760, %v1798_v50  ;;  %2123 = vmatpush.msra.mxu0 %v2712_v0  ;;  %v57_v50 = vld [vmem:[#allocation3 + $0xc8] sm:$0xff] }
 0x3fa   :  { %2096 = vmatpush.msrb.mxu3 %v2714_v2  ;;  %2152 = vmatpush.msra.mxu1 %v2684_v46 }
 0x3fb   :  { %1800 = vmatmul.f32.vlgmr.msrb.gmra.mxu2 %v1799_v53  ;;  %1956 = vmatmul.f32.vlgmr.msra.gmra.mxu3 %v1795_v45  ;;  %v2372_v53 = vsub.f32 %v58_v48, %v2342_v31 }
 0x3fc   :  { %2061 = vmatpush.msrb.mxu2 %v2682_v44  ;;  %2154 = vmatpush.msra.mxu1 %v2700_v60 }
 0x3fd   :  { %2127 = vmatpush.msra.mxu0 %v2742_v14 }
 0x3fe   :  { %2064 = vmatpush.msrb.mxu2 %v2693_v52  ;;  %2156 = vmatpush.msra.mxu1 %v2714_v2  ;;  %v1771_v2 = vmul.f32 %v2847_v51, %v2884_v32  ;;  %v2223_v51 = vsub.f32 %v2221_v6, %v2222_v34 }
 0x3ff   :  { %2131 = vmatpush.msra.mxu0 %v2751_v55 }
 0x400   :  { %2067 = vmatpush.msrb.mxu2 %v2721_v7  ;;  %v2224_v18 = vand.u32 4294901760, %v2223_v51 }
 0x402   :  { %2070 = vmatpush.msrb.mxu2 %v2733_v3  ;;  %2225 = vmatpush.msra.mxu3 %v2224_v18 }
 0x403   :  { %1931 = vmatmul.f32.vlgmr.msra.gmra.mxu2 %v1795_v45 }
 0x404   :  { %2195 = vmatpush.msra.mxu2 %v2194_v33 }
 0x466   :  { %v1764_v39 = vpop.xlane.xlu0 %1763 }
 0x467   :  { %1766 = vst.msk [vmem:[#allocation2] sm:$0xff] %vm1765_vm9, %v1764_v39  ;;  %v2344_v39 = vand.u32 4294901760, %v57_v50 }
 0x472   :  { %v1872_v60 = vpop.f32.mrf.mxu0 }
 0x474   :  { %v1899_v14 = vpop.f32.mrf.mxu1 }
 0x476   :  { %v1842_v46 = vpop.f32.mrf.mxu3 }
 0x47e   :  { %v1801_v44 = vpop.f32.mrf.mxu2  ;;  %v1957_v62 = vpop.f32.mrf.mxu3 }
 0x47f   :  { %v1843_v49 = vadd.f32 %v1842_v46, %v1801_v44  ;;  %v2373_v46 = vand.u32 4294901760, %v2372_v53  ;;  %v2378_v44 = vsub.f32 %v57_v50, %v2344_v39 }
 0x481   :  { %v1873_v0 = vadd.f32 %v1872_v60, %v1843_v49  ;;  %v55_v60 = vld [vmem:[#allocation3 + $0xb8] sm:$0xff] }
 0x483   :  { %v1900_v56 = vadd.f32 %v1899_v14, %v1873_v0  ;;  %v2374_v0 = vsub.f32 %v2372_v53, %v2373_v46  ;;  %v2379_v14 = vand.u32 4294901760, %v2378_v44 }
 0x486   :  { %v1932_v52 = vpop.f32.mrf.mxu2 }
 0x487   :  { %v1933_v55 = vadd.f32 %v1932_v52, %v1900_v56  ;;  %v2348_v52 = vand.u32 4294901760, %v55_v60 }
 0x489   :  { %v1958_v7 = vadd.f32 %v1957_v62, %v1933_v55  ;;  %v2380_v55 = vsub.f32 %v2378_v44, %v2379_v14 }
 0x48b   :  { %v1960_v61 = vadd.f32 %v1958_v7, %v1771_v2  ;;  %v2375_v2 = vand.u32 4294901760, %v2374_v0  ;;  %v2390_v7 = vsub.f32 %v55_v60, %v2348_v52 }
 0x48d   :  { %v1961_v3 = vadd.f32 %v2850_v16, %v1960_v61  ;;  %v2381_v61 = vand.u32 4294901760, %v2380_v55 }
 0x48f   :  { %2565 = vtanh.f32 %v1961_v3 }
 0x495   :  { %v2566_v1 = vpop.eup %2565 }
 0x496   :  { %v1975_v5 = vsel %vm368_vm3, %v2566_v1, 0  ;;  %v1963_v8 = vmul.f32 %v2566_v1, %v2835_v36  ;;  %v2391_v1 = vand.u32 4294901760, %v2390_v7 }
 0x497   :  { %v1997_v9 = vand.u32 4294901760, %v1975_v5 }
 0x498   :  { %v1964_v12 = vsel %vm368_vm3, %v1963_v8, 0.0  ;;  %v2392_v8 = vsub.f32 %v2390_v7, %v2391_v1 }
 0x499   :  { %2043 = vmatmul.f32.vlgmr.msrb.gmra.mxu1 %v1997_v9  ;;  %1965 = vadd.xlane.f32.xlu1 %v1964_v12  ;;  %v1998_v54 = vsub.f32 %v1975_v5, %v1997_v9  ;;  %v2551_v12 = vld [vmem:[#allocation3 + $0x50] ss:$0 sm:$0xff] }
 0x49a   :  { %2271 = vmatpush.msrb.mxu1 %v2194_v33 }
 0x49b   :  { %2073 = vmatmul.f32.vlgmr.msrb.gmra.mxu2 %v1998_v54  ;;  %v1999_v32 = vand.u32 4294901760, %v1998_v54 }
 0x49c   :  { %2297 = vmatpush.msrb.mxu2 %v2222_v34 }
 0x49d   :  { %2100 = vmatmul.f32.vlgmr.msrb.gmra.mxu3 %v1999_v32  ;;  %v2000_v13 = vsub.f32 %v1998_v54, %v1999_v32 }
 0x49e   :  { %2319 = vmatpush.msrb.mxu3 %v2194_v33 }
 0x49f   :  { %v2001_v58 = vand.u32 4294901760, %v2000_v13 }
 0x4a1   :  { %2002 = vmatmul.f32.vlgmr.msrb.gmra.mxu0 %v2001_v58  ;;  %2158 = vmatmul.f32.vlgmr.msra.gmra.mxu1 %v1997_v9 }
 0x4a2   :  { %2248 = vmatpush.msrb.mxu0 %v2221_v6  ;;  %2376 = vmatpush.msra.mxu1 %v2375_v2 }
 0x4a4   :  { %2382 = vmatpush.msra.mxu1 %v2381_v61 }
 0x4a9   :  { %2133 = vmatmul.f32.vlgmr.msra.gmra.mxu0 %v1997_v9  ;;  %v2393_v9 = vand.u32 4294901760, %v2392_v8 }
 0x4aa   :  { %2343 = vmatpush.msra.mxu0 %v2342_v31 }
 0x4ac   :  { %2345 = vmatpush.msra.mxu0 %v2344_v39 }
 0x50c   :  { %v1966_v59 = vpop.xlane.xlu1 %1965 }
 0x50d   :  { %1968 = vst.msk [vmem:[#allocation2] sm:$0xff] %vm1967_vm10, %v1966_v59 }
 0x516   :  { %v2044_v15 = vpop.f32.mrf.mxu1 }
 0x51e   :  { %v2003_v10 = vpop.f32.mrf.mxu0  ;;  %v2074_v20 = vpop.f32.mrf.mxu2 }
 0x51f   :  { %v2045_v19 = vadd.f32 %v2044_v15, %v2003_v10  ;;  %v2159_v57 = vpop.f32.mrf.mxu1 }
 0x520   :  { %v2101_v22 = vpop.f32.mrf.mxu3 }
 0x521   :  { %v2075_v21 = vadd.f32 %v2074_v20, %v2045_v19 }
 0x523   :  { %v2102_v23 = vadd.f32 %v2101_v22, %v2075_v21 }
 0x526   :  { %v2134_v17 = vpop.f32.mrf.mxu0 }
 0x527   :  { %v2135_v25 = vadd.f32 %v2134_v17, %v2102_v23 }
 0x529   :  { %v2160_v11 = vadd.f32 %v2159_v57, %v2135_v25 }
 0x52b   :  { %v2162_v26 = vadd.f32 %v2160_v11, %v1973_v24 }
 0x52d   :  { %v2163_v27 = vadd.f32 %v2850_v16, %v2162_v26 }
 0x52f   :  { %2567 = vtanh.f32 %v2163_v27 }
 0x535   :  { %v2568_v4 = vpop.eup %2567 }
 0x536   :  { %v2165_v28 = vmul.f32 %v2568_v4, %v2835_v36  ;;  %v2552_v4 = vld [vmem:[#allocation3 + $0xd8] ss:$0 sm:$0xff] }
 0x538   :  { %v2166_v29 = vsel %vm368_vm3, %v2165_v28, 0.0 }
 0x539   :  { %2167 = vadd.xlane.f32.xlu2 %v2166_v29 }
 0x5ac   :  { %v2168_v16 = vpop.xlane.xlu2 %2167 }
 0x5ad   :  { %2170 = vst.msk [vmem:[#allocation2] sm:$0xff] %vm2169_vm11, %v2168_v16 }
 0x5b4   :  { %v2171_v36 = vld [vmem:[#allocation2] sm:$0xff] }
 0x5b5   :  { %v2173_v37 = vadd.f32 %v2550_v35, %v2171_v36 }
 0x5b7   :  { %v2174_v38 = vadd.f32 %v2173_v37, %v2845_v63  ;;  %v56_v63 = vld [vmem:[#allocation3 + $0xc0] sm:$0xff] }
 0x5b8   :  { %v2346_v49 = vand.u32 4294901760, %v56_v63 }
 0x5b9   :  { %v2177_v40 = vsel %vm60_vm0, %v2174_v38, 0 }
 0x5ba   :  { %v2196_v41 = vand.u32 4294901760, %v2177_v40  ;;  %v2384_v56 = vsub.f32 %v56_v63, %v2346_v49  ;;  %2347 = vmatpush.msra.mxu0 %v2346_v49 }
 0x5bc   :  { %2227 = vmatmul.f32.vlgmr.msra.gmra.mxu3 %v2196_v41  ;;  %v2197_v42 = vsub.f32 %v2177_v40, %v2196_v41  ;;  %v2385_v62 = vand.u32 4294901760, %v2384_v56  ;;  %2349 = vmatpush.msra.mxu0 %v2348_v52 }
 0x5bd   :  { %2443 = vmatpush.msra.mxu3 %v2342_v31 }
 0x5be   :  { %2251 = vmatmul.f32.vlgmr.msrb.gmra.mxu0 %v2197_v42  ;;  %v2198_v43 = vand.u32 4294901760, %v2197_v42  ;;  %v2386_v3 = vsub.f32 %v2384_v56, %v2385_v62 }
 0x5bf   :  { %2445 = vmatpush.msra.mxu3 %v2344_v39  ;;  %2472 = vmatpush.msrb.mxu0 %v2373_v46 }
 0x5c0   :  { %2275 = vmatmul.f32.vlgmr.msrb.gmra.mxu1 %v2198_v43  ;;  %v2199_v45 = vsub.f32 %v2197_v42, %v2198_v43  ;;  %v2387_v5 = vand.u32 4294901760, %v2386_v3 }
 0x5c1   :  { %2447 = vmatpush.msra.mxu3 %v2346_v49  ;;  %2476 = vmatpush.msrb.mxu0 %v2379_v14 }
 0x5c2   :  { %v2200_v47 = vand.u32 4294901760, %v2199_v45  ;;  %2388 = vmatpush.msra.mxu1 %v2387_v5 }
 0x5c3   :  { %2449 = vmatpush.msra.mxu3 %v2348_v52  ;;  %2480 = vmatpush.msrb.mxu0 %v2385_v62 }
 0x5c4   :  { %2201 = vmatmul.f32.vlgmr.msra.gmra.mxu2 %v2200_v47  ;;  %2321 = vmatmul.f32.vlgmr.msrb.gmra.mxu3 %v2196_v41 }
 0x5c5   :  { %2414 = vmatpush.msra.mxu2 %v2372_v53  ;;  %2394 = vmatpush.msra.mxu1 %v2393_v9 }
 0x5c6   :  { %2484 = vmatpush.msrb.mxu0 %v2391_v1 }
 0x5c7   :  { %2417 = vmatpush.msra.mxu2 %v2378_v44  ;;  %2503 = vmatpush.msrb.mxu1 %v2342_v31 }
 0x5c9   :  { %2420 = vmatpush.msra.mxu2 %v2384_v56  ;;  %2505 = vmatpush.msrb.mxu1 %v2344_v39 }
 0x5cb   :  { %2423 = vmatpush.msra.mxu2 %v2390_v7  ;;  %2507 = vmatpush.msrb.mxu1 %v2346_v49 }
 0x5cc   :  { %2299 = vmatmul.f32.vlgmr.msrb.gmra.mxu2 %v2196_v41 }
 0x5cd   :  { %2509 = vmatpush.msrb.mxu1 %v2348_v52 }
 0x63b   :  { %v2252_v59 = vpop.f32.mrf.mxu0 }
 0x63d   :  { %v2276_v10 = vpop.f32.mrf.mxu1 }
 0x63f   :  { %v2228_v54 = vpop.f32.mrf.mxu3 }
 0x647   :  { %v2202_v32 = vpop.f32.mrf.mxu2  ;;  %v2322_v22 = vpop.f32.mrf.mxu3 }
 0x648   :  { %v2203_v13 = vadd.f32 %v2551_v12, %v2202_v32 }
 0x64a   :  { %v2229_v58 = vadd.f32 %v2228_v54, %v2203_v13 }
 0x64c   :  { %v2253_v15 = vadd.f32 %v2252_v59, %v2229_v58 }
 0x64e   :  { %v2277_v19 = vadd.f32 %v2276_v10, %v2253_v15 }
 0x64f   :  { %v2300_v20 = vpop.f32.mrf.mxu2 }
 0x650   :  { %v2301_v21 = vadd.f32 %v2300_v20, %v2277_v19 }
 0x652   :  { %v2323_v23 = vadd.f32 %v2322_v22, %v2301_v21 }
 0x654   :  { %v2325_v17 = vmax.f32 %v2323_v23, 0.0 }
 0x656   :  { %v2328_v24 = vsel %vm368_vm3, %v2325_v17, 0 }
 0x657   :  { %v2350_v25 = vand.u32 4294901760, %v2328_v24 }
 0x659   :  { %v2351_v57 = vsub.f32 %v2328_v24, %v2350_v25  ;;  %2396 = vmatmul.f32.vlgmr.msra.gmra.mxu1 %v2350_v25 }
 0x65b   :  { %2426 = vmatmul.f32.vlgmr.msra.gmra.mxu2 %v2351_v57  ;;  %v2352_v11 = vand.u32 4294901760, %v2351_v57 }
 0x65d   :  { %2453 = vmatmul.f32.vlgmr.msra.gmra.mxu3 %v2352_v11  ;;  %v2353_v26 = vsub.f32 %v2351_v57, %v2352_v11 }
 0x65f   :  { %v2354_v27 = vand.u32 4294901760, %v2353_v26 }
 0x661   :  { %2355 = vmatmul.f32.vlgmr.msra.gmra.mxu0 %v2354_v27  ;;  %2511 = vmatmul.f32.vlgmr.msrb.gmra.mxu1 %v2350_v25 }
 0x669   :  { %2486 = vmatmul.f32.vlgmr.msrb.gmra.mxu0 %v2350_v25 }
 0x6d6   :  { %v2397_v28 = vpop.f32.mrf.mxu1 }
 0x6de   :  { %v2356_v29 = vpop.f32.mrf.mxu0  ;;  %v2427_v6 = vpop.f32.mrf.mxu2 }
 0x6df   :  { %v2357_v30 = vadd.f32 %v2552_v4, %v2356_v29  ;;  %v2512_v36 = vpop.f32.mrf.mxu1 }
 0x6e0   :  { %v2454_v51 = vpop.f32.mrf.mxu3 }
 0x6e1   :  { %v2398_v33 = vadd.f32 %v2397_v28, %v2357_v30 }
 0x6e3   :  { %v2428_v34 = vadd.f32 %v2427_v6, %v2398_v33 }
 0x6e5   :  { %v2455_v18 = vadd.f32 %v2454_v51, %v2428_v34 }
 0x6e6   :  { %v2487_v16 = vpop.f32.mrf.mxu0 }
 0x6e7   :  { %v2488_v35 = vadd.f32 %v2487_v16, %v2455_v18 }
 0x6e9   :  { %v2513_v37 = vadd.f32 %v2512_v36, %v2488_v35 }
 0x6eb   :  { %2516 = vrot.lane.b32.xlu0 %v2513_v37, %s2597_s18 }
 0x75d   :  { %v2517_v38 = vpop.permute.xlu0 %2516 }
 0x75e   :  { %2520 = vst.msk [vmem:[%s3022_s3] sm:$0xff] %vm2519_vm12, %v2517_v38 }
 0x75f   :  { %2525 = vsyncpa [#allocation4], 1 }

</bundles_post_ra>
